<compile_context>
chip_gen: v6e
topology: v6e:2x2x1
jax: 0.10.0
libtpu: 0.0.40
codegen_flags: <defaults>
</compile_context>

<pallas_src>
import math

import jax
import jax.numpy as jnp
from jax import lax
from jax.experimental import pallas as pl
from jax.experimental.pallas import tpu as pltpu

NEG_INF = -1e30  # finite mask value: avoids inf-inf / NaN hazards


def _round_up(x, m):
    return ((x + m - 1) // m) * m


def _pick_tile(dim, want, quantum=128):
    """Largest multiple of `quantum` that divides `dim`, capped at `want`."""
    want = min(want, dim)
    if dim % want == 0:
        return want
    t = (want // quantum) * quantum
    while t >= quantum:
        if dim % t == 0:
            return t
        t -= quantum
    return dim


def _vmem_limit_bytes():
    # v5e/v6e have 128 MiB VMEM per core, v7x only 64 MiB.  Pick ~3/4 of the
    # physical capacity when it can be queried, else a 48 MiB value that is
    # safe on every generation.
    try:
        cap = pltpu.get_tpu_info().vmem_capacity_bytes
        return int(min(cap * 3 // 4, 112 * 1024 * 1024))
    except Exception:
        return 48 * 1024 * 1024


# ----------------------------------------------------------------------------
# Kernel 1: fused QKV projection  qkv = x @ W_qkv          (lane-dense)
# ----------------------------------------------------------------------------
def _qkv_proj_kernel(x_ref, w_ref, o_ref):
    o_ref[0] = jnp.dot(x_ref[0], w_ref[...],
                       preferred_element_type=jnp.float32).astype(o_ref.dtype)


def qkv_projection(x, w_qkv, *, block_rows=512, block_cols=768):
    """x: (B, T, C); w_qkv: (C, 3*H*hs)  ->  (B, T, 3*H*hs)."""
    B, T, C = x.shape
    N = w_qkv.shape[1]
    tr = _pick_tile(T, block_rows, quantum=8)
    tn = _pick_tile(N, block_cols, quantum=128)
    return pl.pallas_call(
        _qkv_proj_kernel,
        out_shape=jax.ShapeDtypeStruct((B, T, N), x.dtype),
        grid_spec=pltpu.PrefetchScalarGridSpec(
            num_scalar_prefetch=0,
            grid=(B, T // tr, N // tn),
            in_specs=[
                pl.BlockSpec((1, tr, C), lambda b, i, j: (b, i, 0)),
                pl.BlockSpec((C, tn), lambda b, i, j: (0, j)),
            ],
            out_specs=pl.BlockSpec((1, tr, tn), lambda b, i, j: (b, i, j)),
        ),
        compiler_params=pltpu.CompilerParams(
            dimension_semantics=("parallel", "parallel", "parallel"),
            vmem_limit_bytes=_vmem_limit_bytes()),
    )(x, w_qkv)


# ----------------------------------------------------------------------------
# Kernel 2: flash-style causal attention + fused output projection.
# Grid = (B, num_q_tiles, num_heads, num_kv_tiles).
# q/k/v for head h are read out of the packed qkv tensor via BlockSpec
# index maps (last-dim block indices h, H+h, 2H+h).  W_proj is VMEM-resident
# and sliced per head inside the kernel.
# ----------------------------------------------------------------------------
def _make_flash_kernel(tq, tk, head_size, num_heads, approx_reciprocal):

    def kernel(q_ref, k_ref, v_ref, wp_ref, b_ref, o_ref,
               m_sc, l_sc, acc_sc, y_sc):
        qi = pl.program_id(1)
        h = pl.program_id(2)
        ki = pl.program_id(3)
        nk = pl.num_programs(3)

        @pl.when(jnp.logical_and(h == 0, ki == 0))
        def _init_output_acc():
            # proj bias added exactly once per (b, q-tile), in f32
            y_sc[...] = jnp.broadcast_to(
                b_ref[...].astype(jnp.float32), y_sc.shape)

        @pl.when(ki == 0)
        def _init_head_state():
            m_sc[...] = jnp.full(m_sc.shape, NEG_INF, dtype=m_sc.dtype)
            l_sc[...] = jnp.zeros(l_sc.shape, dtype=l_sc.dtype)
            acc_sc[...] = jnp.zeros(acc_sc.shape, dtype=acc_sc.dtype)

        q_lo = qi * tq               # first query row of this tile
        q_hi = qi * tq + (tq - 1)    # last  query row of this tile
        k_lo = ki * tk
        k_hi = ki * tk + (tk - 1)

        def _scores():
            # q already carries the 1/sqrt(hs) factor (folded into W_q).
            return lax.dot_general(
                q_ref[0], k_ref[0],
                dimension_numbers=(((1,), (1,)), ((), ())),
                preferred_element_type=jnp.float32)           # (tq, tk) f32

        def _online_softmax_update(s):
            v = v_ref[0]                                      # (tk, hs)
            m_prev = m_sc[...]
            m_new = jnp.maximum(m_prev, jnp.max(s, axis=-1, keepdims=True))
            alpha = jnp.exp(m_prev - m_new)
            p = jnp.exp(s - m_new)
            l_sc[...] = alpha * l_sc[...] + jnp.sum(p, axis=-1, keepdims=True)
            acc_sc[...] = alpha * acc_sc[...] + jnp.dot(
                p.astype(v.dtype), v, preferred_element_type=jnp.float32)
            m_sc[...] = m_new

        # KV tile fully below the causal diagonal: no mask work needed.
        @pl.when(k_hi <= q_lo)
        def _unmasked_step():
            _online_softmax_update(_scores())

        # KV tile straddling the diagonal: apply the causal mask.
        @pl.when(jnp.logical_and(k_hi > q_lo, k_lo <= q_hi))
        def _masked_step():
            s = _scores()
            row = q_lo + lax.broadcasted_iota(jnp.int32, (tq, tk), 0)
            col = k_lo + lax.broadcasted_iota(jnp.int32, (tq, tk), 1)
            _online_softmax_update(jnp.where(col <= row, s, NEG_INF))

        # KV tiles fully above the diagonal (k_lo > q_hi) do no compute.

        @pl.when(ki == nk - 1)
        def _fold_head_into_projection():
            inv_l = pl.reciprocal(l_sc[...], approx=approx_reciprocal)  # EUP
            head_out = acc_sc[...] * inv_l                    # (tq, hs) f32
            # Per-head rows of the VMEM-resident projection weight.
            row0 = pl.multiple_of(h * head_size, head_size)
            wp = wp_ref[pl.ds(row0, head_size), :]            # (hs, E)
            y_sc[...] += jnp.dot(head_out.astype(wp.dtype), wp,
                                 preferred_element_type=jnp.float32)

        @pl.when(jnp.logical_and(h == num_heads - 1, ki == nk - 1))
        def _store_output():
            o_ref[0] = y_sc[...].astype(o_ref.dtype)

    return kernel


def flash_attention_proj(qkv, w_proj_t, b_proj, num_heads, head_size,
                         *, tq=256, tk=256, approx_reciprocal=True):
    """qkv: (B, T, 3*H*hs); w_proj_t: (H*hs, E); b_proj: (1, E) -> (B, T, E)."""
    B, T, three_hhs = qkv.shape
    assert three_hhs == 3 * num_heads * head_size
    # Per-head BlockSpec slicing of the packed qkv last dim needs a
    # lane-aligned head size (real GPT: n_embd=1536 / 12 heads = 128).
    assert head_size % 128 == 0, "head_size must be a multiple of 128"
    assert T % tq == 0 and T % tk == 0, (T, tq, tk)
    E = w_proj_t.shape[1]
    hhs = num_heads * head_size
    nq, nk = T // tq, T // tk

    kernel = _make_flash_kernel(tq, tk, head_size, num_heads,
                                approx_reciprocal)
    return pl.pallas_call(
        kernel,
        out_shape=jax.ShapeDtypeStruct((B, T, E), qkv.dtype),
        grid_spec=pltpu.PrefetchScalarGridSpec(
            num_scalar_prefetch=0,
            grid=(B, nq, num_heads, nk),
            in_specs=[
                # q is re-fetched only at head switches (index map is constant
                # across the innermost ki axis).
                pl.BlockSpec((1, tq, head_size),
                             lambda b, qi, h, ki: (b, qi, h)),
                pl.BlockSpec((1, tk, head_size),
                             lambda b, qi, h, ki: (b, ki, num_heads + h)),
                pl.BlockSpec((1, tk, head_size),
                             lambda b, qi, h, ki: (b, ki, 2 * num_heads + h)),
                # Output projection weight: fully VMEM-resident (one DMA).
                pl.BlockSpec((hhs, E), lambda b, qi, h, ki: (0, 0)),
                pl.BlockSpec((1, E), lambda b, qi, h, ki: (0, 0)),
            ],
            out_specs=pl.BlockSpec((1, tq, E), lambda b, qi, h, ki: (b, qi, 0)),
            scratch_shapes=[
                pltpu.VMEM((tq, 1), jnp.float32),           # m (running max)
                pltpu.VMEM((tq, 1), jnp.float32),           # l (running sum)
                pltpu.VMEM((tq, head_size), jnp.float32),   # per-head acc
                pltpu.VMEM((tq, E), jnp.float32),           # projected output
            ],
        ),
        compiler_params=pltpu.CompilerParams(
            dimension_semantics=("parallel", "parallel", "arbitrary",
                                 "arbitrary"),
            vmem_limit_bytes=_vmem_limit_bytes()),
    )(qkv, qkv, qkv, w_proj_t, b_proj)


# ----------------------------------------------------------------------------
# Full MultiHeadAttention forward (eval mode: dropouts are identity).
# ----------------------------------------------------------------------------
def pack_params(wq, wk, wv, w_proj, b_proj):
    """wq/wk/wv: (H, C, hs) (transpose of torch Linear weights);
    w_proj: (E, H*hs) torch layout; b_proj: (E,)."""
    H, C, hs = wq.shape

    def to_cols(w):  # (H, C, hs) -> (C, H*hs), heads concatenated on lanes
        return jnp.transpose(w, (1, 0, 2)).reshape(C, H * hs)

    # Fold the 1/sqrt(hs) attention scale into W_q so the kernel never
    # multiplies q by it (removes tq*hs VPU ops per KV step per head).
    scale = hs ** -0.5
    w_qkv = jnp.concatenate(
        [to_cols(wq) * scale, to_cols(wk), to_cols(wv)], axis=-1)
    return {"w_qkv": w_qkv,                      # (C, 3*H*hs)
            "w_proj_t": jnp.transpose(w_proj),   # (H*hs, E)
            "b_proj": b_proj.reshape(1, -1)}     # (1, E)


def multi_head_attention(x, params, num_heads, head_size,
                         *, block_q=256, block_k=256,
                         qkv_block_rows=512, qkv_block_cols=768,
                         approx_reciprocal=True):
    B, T, C = x.shape
    assert block_q % 128 == 0 and block_k % 128 == 0
    # Clamp tiles for short sequences and zero-pad T to a tile multiple:
    # padded K rows are excluded by the causal mask, padded Q rows sliced off.
    tq = min(block_q, _round_up(T, 128))
    tk = min(block_k, _round_up(T, 128))
    t_pad = _round_up(T, tq * tk // math.gcd(tq, tk))
    if t_pad != T:
        x = jnp.pad(x, ((0, 0), (0, t_pad - T), (0, 0)))
    qkv = qkv_projection(x, params["w_qkv"],
                         block_rows=qkv_block_rows, block_cols=qkv_block_cols)
    out = flash_attention_proj(qkv, params["w_proj_t"], params["b_proj"],
                               num_heads, head_size, tq=tq, tk=tk,
                               approx_reciprocal=approx_reciprocal)
    if t_pad != T:
        out = out[:, :T, :]
    return out


# ----------------------------------------------------------------------------
# Pure-JAX reference for sanity checking.
# ----------------------------------------------------------------------------
def reference_mha(x, wq, wk, wv, w_proj, b_proj):
    H, C, hs = wq.shape
    B, T, _ = x.shape
    q = jnp.einsum('btc,hcd->bhtd', x, wq)
    k = jnp.einsum('btc,hcd->bhtd', x, wk)
    v = jnp.einsum('btc,hcd->bhtd', x, wv)
    s = jnp.einsum('bhqd,bhkd->bhqk', q, k) * (hs ** -0.5)
    mask = jnp.tril(jnp.ones((T, T), dtype=bool))
    s = jnp.where(mask, s, -jnp.inf)
    p = jax.nn.softmax(s, axis=-1)
    o = jnp.einsum('bhqk,bhkd->bhqd', p, v)
    cat = jnp.transpose(o, (0, 2, 1, 3)).reshape(B, T, H * hs)
    return cat @ w_proj.T + b_proj


if __name__ == "__main__":
    def run_case(B, T, n_embd, num_heads, head_size, seed=0):
        key = jax.random.PRNGKey(seed)
        kx, kq, kk, kv_, kw, kb = jax.random.split(key, 6)
        x = jax.random.normal(kx, (B, T, n_embd), dtype=jnp.float32)
        s_in = n_embd ** -0.5
        wq = jax.random.normal(kq, (num_heads, n_embd, head_size),
                               dtype=jnp.float32) * s_in
        wk = jax.random.normal(kk, (num_heads, n_embd, head_size),
                               dtype=jnp.float32) * s_in
        wv = jax.random.normal(kv_, (num_heads, n_embd, head_size),
                               dtype=jnp.float32) * s_in
        # proj: torch Linear(H*hs, n_embd): weight (n_embd, H*hs), bias (n_embd,)
        w_proj = jax.random.normal(kw, (n_embd, num_heads * head_size),
                                   dtype=jnp.float32) * (
                                       (num_heads * head_size) ** -0.5)
        b_proj = jax.random.normal(kb, (n_embd,), dtype=jnp.float32) * 0.1
        params = pack_params(wq, wk, wv, w_proj, b_proj)

        out = jax.block_until_ready(
            multi_head_attention(x, params, num_heads, head_size))
        ref = reference_mha(x, wq, wk, wv, w_proj, b_proj)
        assert out.shape == (B, T, n_embd), out.shape
        max_diff = float(jnp.max(jnp.abs(out - ref)))
        assert jnp.allclose(out, ref, atol=3e-2, rtol=3e-2), max_diff
        return x, params

    # T = 768 (the module's block_size) with 256-wide tiles: exercises the
    # unmasked, masked (diagonal) and skipped KV-tile paths (3x3 tiles/head).
    x, params = run_case(B=2, T=768, n_embd=256, num_heads=2, head_size=128)

    # T not a multiple of the tile: exercises the zero-padding path.
    run_case(B=1, T=200, n_embd=256, num_heads=2, head_size=128, seed=1)

    # bf16 path (the fast MXU configuration on v5e/v6e/v7x): run once,
    # sanity-check finiteness (softmax/accumulation stays in f32 in-kernel).
    x_bf = x.astype(jnp.bfloat16)
    params_bf = jax.tree_util.tree_map(
        lambda a: a.astype(jnp.bfloat16), params)
    out_bf = jax.block_until_ready(
        multi_head_attention(x_bf, params_bf, 2, 128))
    assert out_bf.shape == x.shape
    assert bool(jnp.all(jnp.isfinite(out_bf.astype(jnp.float32))))

    print("KERNEL_OK")
</pallas_src>

<mosaic_0001>
module attributes {stable_mosaic.version = 11 : i64} {
  func.func @_qkv_proj_kernel(%arg0: i32, %arg1: i32, %arg2: i32, %arg3: memref<1x384x256xf32, #tpu.memory_space<vmem>>, %arg4: memref<256x768xf32, #tpu.memory_space<vmem>>, %arg5: memref<1x384x768xf32, #tpu.memory_space<vmem>>) attributes {dimension_semantics = [#tpu.dimension_semantics<parallel>, #tpu.dimension_semantics<parallel>, #tpu.dimension_semantics<parallel>], iteration_bounds = array<i64: 2, 2, 1>, scalar_prefetch = 0 : i64, scratch_operands = 0 : i64, tpu.core_type = #tpu.core_type<tc>, window_params = [{transform_indices = @transform_0, window_bounds = array<i64: 1, 384, 256>}, {transform_indices = @transform_1, window_bounds = array<i64: 256, 768>}, {transform_indices = @transform_2, window_bounds = array<i64: 1, 384, 768>}]} {
    %c0 = arith.constant 0 : index
    %c0_0 = arith.constant 0 : index
    %c0_1 = arith.constant 0 : index
    %0 = vector.load %arg3[%c0, %c0_0, %c0_1] : memref<1x384x256xf32, #tpu.memory_space<vmem>>, vector<1x384x256xf32>
    %1 = vector.shape_cast %0 : vector<1x384x256xf32> to vector<384x256xf32>
    %c0_2 = arith.constant 0 : index
    %c0_3 = arith.constant 0 : index
    %2 = vector.load %arg4[%c0_2, %c0_3] : memref<256x768xf32, #tpu.memory_space<vmem>>, vector<256x768xf32>
    %cst = arith.constant dense<0.000000e+00> : vector<384x768xf32>
    %3 = tpu.matmul %1, %2, %cst {dimension_numbers = #tpu.dot_dimension_numbers<[1], [0], [0], [1], [0, 0, 1, 1], [], []>} : vector<384x256xf32>, vector<256x768xf32>, vector<384x768xf32> -> vector<384x768xf32>
    %c0_4 = arith.constant 0 : index
    %c0_5 = arith.constant 0 : index
    %c0_6 = arith.constant 0 : index
    %4 = vector.load %arg5[%c0_4, %c0_5, %c0_6] : memref<1x384x768xf32, #tpu.memory_space<vmem>>, vector<1x384x768xf32>
    %5 = vector.shape_cast %4 : vector<1x384x768xf32> to vector<384x768xf32>
    %6 = vector.shape_cast %3 : vector<384x768xf32> to vector<1x384x768xf32>
    tpu.vector_store %arg5[%c0_4, %c0_5, %c0_6], %6 {strides = array<i32>} : memref<1x384x768xf32, #tpu.memory_space<vmem>>, vector<1x384x768xf32>,
    return
  }
  func.func @transform_0(%arg0: i32, %arg1: i32, %arg2: i32) -> (i32, i32, i32) {
    %c0_i32 = arith.constant 0 : i32
    %c0_i32_0 = arith.constant 0 : i32
    return %arg0, %arg1, %c0_i32 : i32, i32, i32
  }
  func.func @transform_1(%arg0: i32, %arg1: i32, %arg2: i32) -> (i32, i32) {
    %c0_i32 = arith.constant 0 : i32
    %c0_i32_0 = arith.constant 0 : i32
    return %c0_i32, %arg2 : i32, i32
  }
  func.func @transform_2(%arg0: i32, %arg1: i32, %arg2: i32) -> (i32, i32, i32) {
    %c0_i32 = arith.constant 0 : i32
    return %arg0, %arg1, %arg2 : i32, i32, i32
  }
}

</mosaic_0001>

<bundles_post_ra>
// kernel: tpu_custom_call.1
= control target key start
LH: loop header
LB: loop body
LE: loop exit
PB: predicated region body
PF: predicated region fallthrough
CT: control target
= control target key end

     0   :  { %s3349_s0 = inlined_call_operand.hbm [shape: f32[2,768,256], index: 0, kind: input, shape index: {}]   ;;  %s3350_s1 = inlined_call_operand.hbm [shape: f32[256,768], index: 1, kind: input, shape index: {}]   ;;  %s3351_s2 = inlined_call_operand.hbm [shape: f32[2,768,768], index: 2, kind: output, shape index: {}]  }
   0x1   :  { %3409 = sst [smem:[#allocation41_spill]] %s3350_s1 }
   0x2   :  { %7 = vsyncpa [#allocation3], 0 }
   0x3   :  { %9 = vsyncpa [#allocation3 + $0x1], 0 }
   0x4   :  { %10 = vsyncpa [#allocation6], 0 }
   0x5   :  { %11 = vsyncpa [#allocation4], 0 }
   0x6   :  { %13 = vsyncpa [#allocation4 + $0x1], 0  ;;  %s2354_s9 = smov 0   ;;  %s2356_s10 = smov 0  }
   0x7   :  { %s2358_s11 = smov 0   ;;  %s2360_s12 = smov 0  }
   0x8   :  { %s2362_s13 = smov 0   ;;  %s2364_s14 = smov 0  }
   0x9   :  { %s2366_s15 = smov 0   ;;  %s2368_s16 = smov 0  }
   0xa LB: > { %3410 = sst [smem:[#allocation11_spill]] %s2324_s15  ;;  %s1978_s17 = sadd.s32 4294967295, %s2328_s16   ;;  %s2328_s16 = sphi %s2368_s16, %s19_s16   ;;  %s2324_s15 = sphi %s2366_s15, %s3479_s15   ;;  %s2320_s14 = sphi %s2364_s14, %s3484_s14   ;;  %s2316_s13 = sphi %s2362_s13, %s3477_s13   ;;  %s2312_s12 = sphi %s2360_s12, %s3483_s12   ;;  %s2308_s11 = sphi %s2358_s11, %s3482_s11   ;;  %s2304_s10 = sphi %s2356_s10, %s3481_s10   ;;  %s2300_s9 = sphi %s2354_s9, %s3480_s9  }
   0xb   : > { %s1979_s18 = sadd.s32 4294967294, %s2328_s16   ;;  %p60_p0 = scmp.ne.s32.totalorder %s2304_s10, %s2300_s9 }
   0xc   : > { %p2398_p1 = scmp.eq.s32.totalorder %s1978_s17, 0  ;;  %p2402_p2 = scmp.eq.s32.totalorder %s1978_s17, 3 }
   0xd   : > { %p120_p3 = scmp.eq.s32.totalorder %s1979_s18, 3  ;;  %p1980_p5 = scmp.ge.s32.totalorder %s2328_s16, 1 }
   0xe   : > { %p2408_p4 = por %p2398_p1, %p60_p0  ;;  %p127_p7 = scmp.lt.s32.totalorder %s2328_s16, 5 }
   0xf   : > { %p2413_p6 = por %p120_p3, %p60_p0  ;;  %s2330_s24 = smov [#allocation5]  }
  0x10   : > { %s3413_s21 = scalar_select %p2408_p4, 1, 0 }
  0x11   : > { %s3414_s22 = scalar_select %p2413_p6, 1, 0 }
  0x12   : > { %p2418_p8 = pnand %p1980_p5, %p127_p7  ;;  %s142_s25 = sshll.u32 %s2330_s24, 4  ;;  %s143_s25 = int_to_ptr.vmem [resolvable:$true] %s142_s25 }
  0x13   : > { %3415 = sst [smem:[#allocation12_spill]] %s3414_s22  ;;  %s2185_s26 = scalar_lea.vmem %s143_s25, 24576 }
  0x14   : > { %p2069_p9 = pneg %p2418_p8  ;;  %p2186_p12 = scmp.ne.s32.totalorder %s143_s25, %s2185_s26 }
  0x15   : > { %p2193_p3 = scmp.lt.s32.totalorder %s143_s25, %s143_s25  ;;  %p2194_p6 = scmp.lt.s32.totalorder %s2185_s26, %s2185_s26 }
  0x16   : > { %p2070_p10 = pnand %p2069_p9, %p2398_p1 }
  0x17   : > { %p2195_p4 = por %p2194_p6, %p2193_p3 }
  0x18   : > { %p2176_p11 = pneg %p2070_p10 }
  0x1a   : > { %p2188_p13 = pnand %p2186_p12, %p2176_p11 }
  0x1c   : > { %p2189_p0 = pneg %p2188_p13 }
  0x1e   : > { %p2196_p5 = pnand %p2195_p4, %p2189_p0 }
  0x20   : > { %2199 = shalt.err (!%p2196_p5)
}
  0x21   : > { %s2331_s27 = smov 768   ;;  %s2332_s28 = smov 48  }
  0x22   : > { %s3417_s1 = sld [smem:[#allocation41_spill]]  ;;  %s34_s3 = sadd.s32 1, %s2320_s14 }
  0x23   : > { %p36_p4 = scmp.ge.s32.totalorder %s34_s3, 2  ;;  %s38_s4 = sadd.s32 1, %s2324_s15 }
  0x24   : > { %s47_s5 = sadd.s32 1, %s2308_s11  ;;  %p54_p6 = scmp.ne.s32.totalorder %s2308_s11, %s2304_s10 }
  0x25   : > { %s3486_s3 = smov (%p36_p4, %s34_s3), 0  ;;  %s3488_s4 = smov (!%p36_p4, %s38_s4), %s2324_s15 }
  0x26   : > { %3418 = sst [smem:[#allocation13_spill]] %s3486_s3  ;;  %s43_s6 = ssub.s32 %s2320_s14, %s3486_s3 }
  0x27   : > { %p55_p7 = scmp.eq.s32.totalorder %s2328_s16, 0  ;;  %p40_p9 = scmp.ge.s32.totalorder %s3488_s4, 2 }
  0x28   : > { %2072 = dma.hbm_to_vmem [thread:$0]  (!%p2070_p10), %s3417_s1, 24576, %s143_s25, [#allocation6], %s2331_s27, %s2331_s27, %s2332_s28  }
  0x29   : > { %p2442_p11 = por %p2402_p2, %p54_p6  ;;  %p56_p10 = por %p55_p7, %p54_p6 }
  0x2a   : > { %p2082_p12 = scmp.lt.s32.totalorder %s2328_s16, 4  ;;  %s3490_s4 = smov (%p40_p9, %s3488_s4), 0 }
  0x2b   : > { %3420 = sst [smem:[#allocation14_spill]] %s3490_s4  ;;  %s156_s8 = sand.u32 1, %s2308_s11  }
  0x2c   : > { %s1990_s17 = smul.u32 96, %s2320_s14  ;;  %s42_s18 = ssub.s32 %s2324_s15, %s3490_s4 }
  0x2d   : > { %s44_s24 = sor.u32 %s43_s6, %s42_s18  ;;  %s2055_s25 = smul.u32 768, %s156_s8 }
  0x2e   : > { %p45_p13 = scmp.eq.s32.totalorder %s44_s24, 0  ;;  %s2056_s26 = smul.u32 192, %s2324_s15 }
  0x2f   : > { %p2454_p0 = pnand %p2082_p12, %p56_p10  ;;  %s160_s29 = scalar_lea.vmem [#allocation2], %s2055_s25 }
  0x30   : > { %s2459_s20 = scalar_select %p45_p13, %s2308_s11, %s47_s5  }
  0x31   : > { %s167_s28 = sadd.s32 %s2056_s26, %s1990_s17  ;;  %s170_s30 = sshll.u32 %s160_s29, 4  ;;  %s171_s30 = int_to_ptr.vmem [resolvable:$true] %s170_s30 }
  0x32   : > { %s1984_s1 = sshll.u32 %s167_s28, 7  ;;  %s157_s6 = scalar_lea.sflag [#allocation3], %s156_s8 }
  0x33   : > { %s169_s4 = scalar_lea.hbm %s3349_s0, %s1984_s1  ;;  %p2202_p2 = pneg %p2454_p0 }
  0x34   : > { %s2213_s18 = scalar_lea.vmem %s171_s30, 12288  ;;  %s2333_s24 = smov [#allocation2]  }
  0x35   : > { %p2214_p3 = scmp.ne.s32.totalorder %s171_s30, %s2213_s18  ;;  %s2218_s15 = sshll.u32 %s2333_s24, 4  ;;  %s2219_s15 = int_to_ptr.vmem [resolvable:$false] %s2218_s15 }
  0x36   : > { %s2220_s5 = scalar_lea.vmem %s2219_s15, 24576  ;;  %p2221_p6 = scmp.lt.s32.totalorder %s171_s30, %s2219_s15 }
  0x37   : > { %p2216_p5 = pnand %p2214_p3, %p2202_p2  ;;  %p2222_p7 = scmp.lt.s32.totalorder %s2220_s5, %s2213_s18 }
  0x39   : > { %p2217_p4 = pneg %p2216_p5  ;;  %p2223_p9 = por %p2222_p7, %p2221_p6 }
  0x3b   : > { %p2224_p10 = pnand %p2223_p9, %p2217_p4 }
  0x3d   : > { %2227 = shalt.err (!%p2224_p10)
}
  0x3e   : > { %s2334_s17 = smov 256   ;;  %s2335_s22 = smov 16  }
  0x3f   : > { %2076 = dma.hbm_to_vmem [thread:$0]  (!%p2454_p0), %s169_s4, 12288, %s171_s30, %s157_s6, %s2334_s17, %s2334_s17, %s2335_s22  }
  0x40   : > { %182 = sbr.rel (%p2418_p8) target bundleno = 651 (0x28b), region = 28 }
  0x45   : > { %s2471_s1 = sand.u32 1, %s2304_s10   ;;  %p3422_p12 = scmp.ne.s32.totalorder %s3413_s21, 0 }
  0x46   : > { %s2057_s3 = smul.u32 768, %s2471_s1  ;;  %s185_s15 = scalar_lea.sflag [#allocation3], %s2471_s1 }
  0x48   : > { %s2475_s8 = scalar_lea.vmem [#allocation2], %s2057_s3 }
  0x49   : > { %2287 = dma.done.wait (%p3422_p12), %s185_s15, 12288  }
  0x4a   : > { %2289 = vsyncadd (%p3422_p12), %s185_s15, 4294955008 }
  0x4b   : > { %2291 = dma.done.wait (%p2398_p1), [#allocation6], 24576  }
  0x4c   : > { %2293 = vsyncadd (%p2398_p1), [#allocation6], 4294942720  ;;  %v404_v0 = vld [vmem:[#allocation5 + $0x2d8] sm:$0xff]  ;;  %v403_v1 = vld [vmem:[#allocation5 + $0x2d0] sm:$0xff]  ;;  %s2058_s19 = smul.u32 2304, %s2471_s1  ;;  %s1853_s29 = scalar_lea.sflag [#allocation4], %s2471_s1 }
  0x4d   : > { %v398_v2 = vld [vmem:[#allocation5 + $0x2a8] sm:$0xff]  ;;  %505 = vmatprep.subr.mxu0 %v404_v0  ;;  %1991 = vmatprep.subr.mxu1 %v404_v0  ;;  %v397_v3 = vld [vmem:[#allocation5 + $0x2a0] sm:$0xff]  ;;  %v392_v4 = vld [vmem:[#allocation5 + $0x278] sm:$0xff]  ;;  %s2084_s23 = smul.u32 288, %s2312_s12  ;;  %s2336_s6 = smov [#allocation7]  }
  0x4e   : > { %506 = vmatpush1.msra.mxu0 %v403_v1  ;;  %2023 = vmatpush1.msra.mxu1 %v403_v1  ;;  %v391_v5 = vld [vmem:[#allocation5 + $0x270] sm:$0xff]  ;;  %v386_v6 = vld [vmem:[#allocation5 + $0x248] sm:$0xff]  ;;  %v385_v7 = vld [vmem:[#allocation5 + $0x240] sm:$0xff]  ;;  %s2908_s21 = scalar_lea.vmem [#allocation7], %s2058_s19  ;;  %s2060_s4 = smul.u32 576, %s2316_s13 }
  0x4f   : > { %507 = vmatprep.subr.mxu0 %v398_v2  ;;  %1992 = vmatprep.subr.mxu1 %v398_v2  ;;  %v380_v8 = vld [vmem:[#allocation5 + $0x218] sm:$0xff]  ;;  %v379_v9 = vld [vmem:[#allocation5 + $0x210] sm:$0xff]  ;;  %v374_v10 = vld [vmem:[#allocation5 + $0x1e8] sm:$0xff]  ;;  %s1871_s13 = sshll.u32 %s2908_s21, 4  ;;  %s2232_s18 = sshll.u32 %s2336_s6, 4  ;;  %s3292_s13 = int_to_ptr.vmem [resolvable:$true] %s1871_s13  ;;  %s2233_s18 = int_to_ptr.vmem [resolvable:$false] %s2232_s18 }
  0x50   : > { %508 = vmatpush1.msra.mxu0 %v397_v3  ;;  %2024 = vmatpush1.msra.mxu1 %v397_v3  ;;  %v373_v11 = vld [vmem:[#allocation5 + $0x1e0] sm:$0xff]  ;;  %v368_v12 = vld [vmem:[#allocation5 + $0x1b8] sm:$0xff]  ;;  %v367_v13 = vld [vmem:[#allocation5 + $0x1b0] sm:$0xff]  ;;  %s1868_s25 = sadd.s32 %s2084_s23, %s2060_s4  ;;  %s2228_s30 = scalar_lea.vmem %s3292_s13, 36864 }
  0x51   : > { %509 = vmatprep.subr.mxu0 %v392_v4  ;;  %1993 = vmatprep.subr.mxu1 %v392_v4  ;;  %v362_v14 = vld [vmem:[#allocation5 + $0x188] sm:$0xff]  ;;  %v361_v15 = vld [vmem:[#allocation5 + $0x180] sm:$0xff]  ;;  %v356_v16 = vld [vmem:[#allocation5 + $0x158] sm:$0xff]  ;;  %s1987_s12 = sshll.u32 %s1868_s25, 7  ;;  %p2229_p1 = scmp.ne.s32.totalorder %s3292_s13, %s2228_s30 }
  0x52   : > { %510 = vmatpush1.msra.mxu0 %v391_v5  ;;  %2025 = vmatpush1.msra.mxu1 %v391_v5  ;;  %v355_v17 = vld [vmem:[#allocation5 + $0x150] sm:$0xff]  ;;  %v350_v18 = vld [vmem:[#allocation5 + $0x128] sm:$0xff]  ;;  %v349_v19 = vld [vmem:[#allocation5 + $0x120] sm:$0xff]  ;;  %s3290_s28 = scalar_lea.hbm %s3351_s2, %s1987_s12  ;;  %s2234_s24 = scalar_lea.vmem %s2233_s18, 73728 }
  0x53   : > { %511 = vmatprep.subr.mxu0 %v386_v6  ;;  %1994 = vmatprep.subr.mxu1 %v386_v6  ;;  %v344_v20 = vld [vmem:[#allocation5 + $0xf8] sm:$0xff]  ;;  %v343_v21 = vld [vmem:[#allocation5 + $0xf0] sm:$0xff]  ;;  %v338_v22 = vld [vmem:[#allocation5 + $0xc8] sm:$0xff]  ;;  %p2230_p8 = pnand %p2229_p1, %p2442_p11  ;;  %p2235_p0 = scmp.lt.s32.totalorder %s3292_s13, %s2233_s18 }
  0x54   : > { %512 = vmatpush1.msra.mxu0 %v385_v7  ;;  %2026 = vmatpush1.msra.mxu1 %v385_v7  ;;  %v337_v23 = vld [vmem:[#allocation5 + $0xc0] sm:$0xff]  ;;  %v332_v24 = vld [vmem:[#allocation5 + $0x98] sm:$0xff]  ;;  %v331_v25 = vld [vmem:[#allocation5 + $0x90] sm:$0xff]  ;;  %p2236_p2 = scmp.lt.s32.totalorder %s2234_s24, %s2228_s30 }
  0x55   : > { %513 = vmatprep.subr.mxu0 %v380_v8  ;;  %1995 = vmatprep.subr.mxu1 %v380_v8  ;;  %v326_v26 = vld [vmem:[#allocation5 + $0x68] sm:$0xff]  ;;  %v325_v27 = vld [vmem:[#allocation5 + $0x60] sm:$0xff]  ;;  %v320_v28 = vld [vmem:[#allocation5 + $0x38] sm:$0xff]  ;;  %p2231_p13 = pneg %p2230_p8 }
  0x56   : > { %514 = vmatpush1.msra.mxu0 %v379_v9  ;;  %2027 = vmatpush1.msra.mxu1 %v379_v9  ;;  %v319_v29 = vld [vmem:[#allocation5 + $0x30] sm:$0xff]  ;;  %v314_v30 = vld [vmem:[#allocation5 + $0x8] sm:$0xff]  ;;  %v313_v31 = vld [vmem:[#allocation5] sm:$0xff]  ;;  %p2237_p3 = por %p2236_p2, %p2235_p0 }
  0x57   : > { %515 = vmatprep.subr.mxu0 %v374_v10  ;;  %1996 = vmatprep.subr.mxu1 %v374_v10  ;;  %v500_v32 = vld [vmem:[#allocation5 + $0x5d8] sm:$0xff]  ;;  %v499_v33 = vld [vmem:[#allocation5 + $0x5d0] sm:$0xff]  ;;  %v494_v34 = vld [vmem:[#allocation5 + $0x5a8] sm:$0xff] }
  0x58   : > { %516 = vmatpush1.msra.mxu0 %v373_v11  ;;  %2028 = vmatpush1.msra.mxu1 %v373_v11  ;;  %v493_v35 = vld [vmem:[#allocation5 + $0x5a0] sm:$0xff]  ;;  %v488_v36 = vld [vmem:[#allocation5 + $0x578] sm:$0xff]  ;;  %v487_v37 = vld [vmem:[#allocation5 + $0x570] sm:$0xff]  ;;  %p2238_p5 = pnand %p2237_p3, %p2231_p13 }
  0x59   : > { %517 = vmatprep.subr.mxu0 %v368_v12  ;;  %1997 = vmatprep.subr.mxu1 %v368_v12  ;;  %v482_v38 = vld [vmem:[#allocation5 + $0x548] sm:$0xff]  ;;  %v481_v39 = vld [vmem:[#allocation5 + $0x540] sm:$0xff]  ;;  %v476_v40 = vld [vmem:[#allocation5 + $0x518] sm:$0xff] }
  0x5a   : > { %518 = vmatpush1.msra.mxu0 %v367_v13  ;;  %2029 = vmatpush1.msra.mxu1 %v367_v13  ;;  %v475_v41 = vld [vmem:[#allocation5 + $0x510] sm:$0xff]  ;;  %v470_v42 = vld [vmem:[#allocation5 + $0x4e8] sm:$0xff]  ;;  %v469_v43 = vld [vmem:[#allocation5 + $0x4e0] sm:$0xff] }
  0x5b   : > { %519 = vmatprep.subr.mxu0 %v362_v14  ;;  %1998 = vmatprep.subr.mxu1 %v362_v14  ;;  %v464_v44 = vld [vmem:[#allocation5 + $0x4b8] sm:$0xff]  ;;  %v463_v45 = vld [vmem:[#allocation5 + $0x4b0] sm:$0xff]  ;;  %v458_v46 = vld [vmem:[#allocation5 + $0x488] sm:$0xff] }
  0x5c   : > { %520 = vmatpush1.msra.mxu0 %v361_v15  ;;  %2030 = vmatpush1.msra.mxu1 %v361_v15  ;;  %v457_v47 = vld [vmem:[#allocation5 + $0x480] sm:$0xff]  ;;  %v452_v48 = vld [vmem:[#allocation5 + $0x458] sm:$0xff]  ;;  %v451_v49 = vld [vmem:[#allocation5 + $0x450] sm:$0xff] }
  0x5d   : > { %521 = vmatprep.subr.mxu0 %v356_v16  ;;  %1999 = vmatprep.subr.mxu1 %v356_v16  ;;  %v446_v50 = vld [vmem:[#allocation5 + $0x428] sm:$0xff]  ;;  %v445_v51 = vld [vmem:[#allocation5 + $0x420] sm:$0xff]  ;;  %v440_v52 = vld [vmem:[#allocation5 + $0x3f8] sm:$0xff] }
  0x5e   : > { %522 = vmatpush1.msra.mxu0 %v355_v17  ;;  %2031 = vmatpush1.msra.mxu1 %v355_v17  ;;  %v439_v53 = vld [vmem:[#allocation5 + $0x3f0] sm:$0xff]  ;;  %v434_v54 = vld [vmem:[#allocation5 + $0x3c8] sm:$0xff]  ;;  %v433_v55 = vld [vmem:[#allocation5 + $0x3c0] sm:$0xff] }
  0x5f   : > { %523 = vmatprep.subr.mxu0 %v350_v18  ;;  %2000 = vmatprep.subr.mxu1 %v350_v18  ;;  %v428_v56 = vld [vmem:[#allocation5 + $0x398] sm:$0xff]  ;;  %v427_v57 = vld [vmem:[#allocation5 + $0x390] sm:$0xff]  ;;  %v422_v58 = vld [vmem:[#allocation5 + $0x368] sm:$0xff] }
  0x60   : > { %524 = vmatpush1.msra.mxu0 %v349_v19  ;;  %2032 = vmatpush1.msra.mxu1 %v349_v19  ;;  %v421_v59 = vld [vmem:[#allocation5 + $0x360] sm:$0xff]  ;;  %v416_v60 = vld [vmem:[#allocation5 + $0x338] sm:$0xff]  ;;  %v415_v61 = vld [vmem:[#allocation5 + $0x330] sm:$0xff] }
  0x61   : > { %525 = vmatprep.subr.mxu0 %v344_v20  ;;  %2001 = vmatprep.subr.mxu1 %v344_v20  ;;  %v410_v62 = vld [vmem:[#allocation5 + $0x308] sm:$0xff]  ;;  %v409_v63 = vld [vmem:[#allocation5 + $0x300] sm:$0xff]  ;;  %v408_v5 = vld [vmem:[#allocation5 + $0x2f8] sm:$0xff] }
  0x62   : > { %526 = vmatpush1.msra.mxu0 %v343_v21  ;;  %2033 = vmatpush1.msra.mxu1 %v343_v21  ;;  %v2486_v0 = vld [vmem:[%s2475_s8 + $0x8] sm:$0xff]  ;;  %v2490_v2 = vld [vmem:[%s2475_s8] sm:$0xff]  ;;  %v407_v7 = vld [vmem:[#allocation5 + $0x2f0] sm:$0xff] }
  0x63   : > { %527 = vmatprep.subr.mxu0 %v338_v22  ;;  %2002 = vmatprep.subr.mxu1 %v338_v22  ;;  %v266_v1 = vld [vmem:[%s2475_s8 + $0x188] sm:$0xff]  ;;  %v265_v3 = vld [vmem:[%s2475_s8 + $0x180] sm:$0xff]  ;;  %v2496_v8 = vld [vmem:[%s2475_s8 + $0x18] sm:$0xff] }
  0x64   : > { %528 = vmatpush1.msra.mxu0 %v337_v23  ;;  %2034 = vmatpush1.msra.mxu1 %v337_v23  ;;  %v406_v4 = vld [vmem:[#allocation5 + $0x2e8] sm:$0xff]  ;;  %v405_v6 = vld [vmem:[#allocation5 + $0x2e0] sm:$0xff]  ;;  %v268_v9 = vld [vmem:[%s2475_s8 + $0x198] sm:$0xff] }
  0x65   : > { %529 = vmatprep.subr.mxu0 %v332_v24  ;;  %2003 = vmatprep.subr.mxu1 %v332_v24  ;;  %v400_v10 = vld [vmem:[#allocation5 + $0x2b8] sm:$0xff]  ;;  %v402_v11 = vld [vmem:[#allocation5 + $0x2c8] sm:$0xff]  ;;  %v2500_v12 = vld [vmem:[%s2475_s8 + $0x10] sm:$0xff] }
  0x66   : > { %530 = vmatpush1.msra.mxu0 %v331_v25  ;;  %2035 = vmatpush1.msra.mxu1 %v331_v25  ;;  %v267_v13 = vld [vmem:[%s2475_s8 + $0x190] sm:$0xff]  ;;  %v401_v15 = vld [vmem:[#allocation5 + $0x2c0] sm:$0xff]  ;;  %v394_v16 = vld [vmem:[#allocation5 + $0x288] sm:$0xff] }
  0x67   : > { %531 = vmatprep.subr.mxu0 %v326_v26  ;;  %2004 = vmatprep.subr.mxu1 %v326_v26  ;;  %v399_v14 = vld [vmem:[#allocation5 + $0x2b0] sm:$0xff]  ;;  %v396_v17 = vld [vmem:[#allocation5 + $0x298] sm:$0xff]  ;;  %v2506_v18 = vld [vmem:[%s2475_s8 + $0x28] sm:$0xff] }
  0x68   : > { %532 = vmatpush1.msra.mxu0 %v325_v27  ;;  %2036 = vmatpush1.msra.mxu1 %v325_v27  ;;  %v270_v19 = vld [vmem:[%s2475_s8 + $0x1a8] sm:$0xff]  ;;  %v393_v20 = vld [vmem:[#allocation5 + $0x280] sm:$0xff]  ;;  %v395_v21 = vld [vmem:[#allocation5 + $0x290] sm:$0xff] }
  0x69   : > { %533 = vmatprep.subr.mxu0 %v320_v28  ;;  %2005 = vmatprep.subr.mxu1 %v320_v28  ;;  %v2510_v22 = vld [vmem:[%s2475_s8 + $0x20] sm:$0xff]  ;;  %v388_v24 = vld [vmem:[#allocation5 + $0x258] sm:$0xff]  ;;  %v390_v25 = vld [vmem:[#allocation5 + $0x268] sm:$0xff] }
  0x6a   : > { %534 = vmatpush1.msra.mxu0 %v319_v29  ;;  %2037 = vmatpush1.msra.mxu1 %v319_v29  ;;  %v269_v23 = vld [vmem:[%s2475_s8 + $0x1a0] sm:$0xff]  ;;  %v387_v26 = vld [vmem:[#allocation5 + $0x250] sm:$0xff]  ;;  %v2516_v28 = vld [vmem:[%s2475_s8 + $0x38] sm:$0xff] }
  0x6b   : > { %535 = vmatprep.subr.mxu0 %v314_v30  ;;  %2006 = vmatprep.subr.mxu1 %v314_v30  ;;  %v389_v27 = vld [vmem:[#allocation5 + $0x260] sm:$0xff]  ;;  %v272_v29 = vld [vmem:[%s2475_s8 + $0x1b8] sm:$0xff]  ;;  %v2520_v30 = vld [vmem:[%s2475_s8 + $0x30] sm:$0xff] }
  0x6c   : > { %536 = vmatpush1.msra.mxu0 %v313_v31  ;;  %2038 = vmatpush1.msra.mxu1 %v313_v31  ;;  %v271_v31 = vld [vmem:[%s2475_s8 + $0x1b0] sm:$0xff] }
  0x6d   : > { %537 = vmatprep.subr.mxu0 %v500_v32  ;;  %2007 = vmatprep.subr.mxu1 %v500_v32  ;;  %v382_v32 = vld [vmem:[#allocation5 + $0x228] sm:$0xff] }
  0x6e   : > { %538 = vmatpush2.msra.mxu0 %v499_v33  ;;  %2039 = vmatpush2.msra.mxu1 %v499_v33  ;;  %v384_v33 = vld [vmem:[#allocation5 + $0x238] sm:$0xff] }
  0x6f   : > { %539 = vmatprep.subr.mxu0 %v494_v34  ;;  %2008 = vmatprep.subr.mxu1 %v494_v34  ;;  %v381_v34 = vld [vmem:[#allocation5 + $0x220] sm:$0xff] }
  0x70   : > { %540 = vmatpush2.msra.mxu0 %v493_v35  ;;  %2040 = vmatpush2.msra.mxu1 %v493_v35  ;;  %v383_v35 = vld [vmem:[#allocation5 + $0x230] sm:$0xff] }
  0x71   : > { %541 = vmatprep.subr.mxu0 %v488_v36  ;;  %2009 = vmatprep.subr.mxu1 %v488_v36  ;;  %v2526_v36 = vld [vmem:[%s2475_s8 + $0x48] sm:$0xff] }
  0x72   : > { %542 = vmatpush2.msra.mxu0 %v487_v37  ;;  %2041 = vmatpush2.msra.mxu1 %v487_v37  ;;  %v274_v37 = vld [vmem:[%s2475_s8 + $0x1c8] sm:$0xff] }
  0x73   : > { %543 = vmatprep.subr.mxu0 %v482_v38  ;;  %2010 = vmatprep.subr.mxu1 %v482_v38  ;;  %v376_v38 = vld [vmem:[#allocation5 + $0x1f8] sm:$0xff] }
  0x74   : > { %544 = vmatpush2.msra.mxu0 %v481_v39  ;;  %2042 = vmatpush2.msra.mxu1 %v481_v39  ;;  %v378_v39 = vld [vmem:[#allocation5 + $0x208] sm:$0xff] }
  0x75   : > { %545 = vmatprep.subr.mxu0 %v476_v40  ;;  %2011 = vmatprep.subr.mxu1 %v476_v40  ;;  %v2530_v40 = vld [vmem:[%s2475_s8 + $0x40] sm:$0xff] }
  0x76   : > { %546 = vmatpush2.msra.mxu0 %v475_v41  ;;  %2043 = vmatpush2.msra.mxu1 %v475_v41  ;;  %v273_v41 = vld [vmem:[%s2475_s8 + $0x1c0] sm:$0xff] }
  0x77   : > { %547 = vmatprep.subr.mxu0 %v470_v42  ;;  %2012 = vmatprep.subr.mxu1 %v470_v42  ;;  %v375_v42 = vld [vmem:[#allocation5 + $0x1f0] sm:$0xff] }
  0x78   : > { %548 = vmatpush2.msra.mxu0 %v469_v43  ;;  %2044 = vmatpush2.msra.mxu1 %v469_v43  ;;  %v377_v43 = vld [vmem:[#allocation5 + $0x200] sm:$0xff] }
  0x79   : > { %549 = vmatprep.subr.mxu0 %v464_v44  ;;  %2013 = vmatprep.subr.mxu1 %v464_v44  ;;  %v370_v44 = vld [vmem:[#allocation5 + $0x1c8] sm:$0xff] }
  0x7a   : > { %550 = vmatpush2.msra.mxu0 %v463_v45  ;;  %2045 = vmatpush2.msra.mxu1 %v463_v45  ;;  %v372_v45 = vld [vmem:[#allocation5 + $0x1d8] sm:$0xff] }
  0x7b   : > { %551 = vmatprep.subr.mxu0 %v458_v46  ;;  %2014 = vmatprep.subr.mxu1 %v458_v46  ;;  %v2536_v46 = vld [vmem:[%s2475_s8 + $0x58] sm:$0xff] }
  0x7c   : > { %552 = vmatpush2.msra.mxu0 %v457_v47  ;;  %2046 = vmatpush2.msra.mxu1 %v457_v47  ;;  %v276_v47 = vld [vmem:[%s2475_s8 + $0x1d8] sm:$0xff] }
  0x7d   : > { %553 = vmatprep.subr.mxu0 %v452_v48  ;;  %2015 = vmatprep.subr.mxu1 %v452_v48  ;;  %v369_v48 = vld [vmem:[#allocation5 + $0x1c0] sm:$0xff] }
  0x7e   : > { %554 = vmatpush2.msra.mxu0 %v451_v49  ;;  %2047 = vmatpush2.msra.mxu1 %v451_v49  ;;  %v371_v49 = vld [vmem:[#allocation5 + $0x1d0] sm:$0xff] }
  0x7f   : > { %555 = vmatprep.subr.mxu0 %v446_v50  ;;  %2016 = vmatprep.subr.mxu1 %v446_v50  ;;  %v2540_v50 = vld [vmem:[%s2475_s8 + $0x50] sm:$0xff] }
  0x80   : > { %556 = vmatpush2.msra.mxu0 %v445_v51  ;;  %2048 = vmatpush2.msra.mxu1 %v445_v51  ;;  %v275_v51 = vld [vmem:[%s2475_s8 + $0x1d0] sm:$0xff] }
  0x81   : > { %557 = vmatprep.subr.mxu0 %v440_v52  ;;  %2017 = vmatprep.subr.mxu1 %v440_v52  ;;  %v364_v52 = vld [vmem:[#allocation5 + $0x198] sm:$0xff] }
  0x82   : > { %558 = vmatpush2.msra.mxu0 %v439_v53  ;;  %2049 = vmatpush2.msra.mxu1 %v439_v53  ;;  %v366_v53 = vld [vmem:[#allocation5 + $0x1a8] sm:$0xff] }
  0x83   : > { %559 = vmatprep.subr.mxu0 %v434_v54  ;;  %2018 = vmatprep.subr.mxu1 %v434_v54  ;;  %v363_v54 = vld [vmem:[#allocation5 + $0x190] sm:$0xff] }
  0x84   : > { %560 = vmatpush2.msra.mxu0 %v433_v55  ;;  %2050 = vmatpush2.msra.mxu1 %v433_v55  ;;  %v365_v55 = vld [vmem:[#allocation5 + $0x1a0] sm:$0xff] }
  0x85   : > { %561 = vmatprep.subr.mxu0 %v428_v56  ;;  %2019 = vmatprep.subr.mxu1 %v428_v56  ;;  %v2546_v56 = vld [vmem:[%s2475_s8 + $0x68] sm:$0xff] }
  0x86   : > { %562 = vmatpush2.msra.mxu0 %v427_v57  ;;  %2051 = vmatpush2.msra.mxu1 %v427_v57  ;;  %v278_v57 = vld [vmem:[%s2475_s8 + $0x1e8] sm:$0xff] }
  0x87   : > { %563 = vmatprep.subr.mxu0 %v422_v58  ;;  %2020 = vmatprep.subr.mxu1 %v422_v58  ;;  %v2550_v58 = vld [vmem:[%s2475_s8 + $0x60] sm:$0xff] }
  0x88   : > { %564 = vmatpush2.msra.mxu0 %v421_v59  ;;  %2052 = vmatpush2.msra.mxu1 %v421_v59  ;;  %v277_v59 = vld [vmem:[%s2475_s8 + $0x1e0] sm:$0xff] }
  0x89   : > { %565 = vmatprep.subr.mxu0 %v416_v60  ;;  %2021 = vmatprep.subr.mxu1 %v416_v60  ;;  %v358_v60 = vld [vmem:[#allocation5 + $0x168] sm:$0xff] }
  0x8a   : > { %566 = vmatpush2.msra.mxu0 %v415_v61  ;;  %2053 = vmatpush2.msra.mxu1 %v415_v61  ;;  %v360_v61 = vld [vmem:[#allocation5 + $0x178] sm:$0xff] }
  0x8b   : > { %567 = vmatprep.subr.mxu0 %v410_v62  ;;  %2022 = vmatprep.subr.mxu1 %v410_v62  ;;  %v357_v62 = vld [vmem:[#allocation5 + $0x160] sm:$0xff] }
  0x8c   : > { %568 = vmatpush2.msra.mxu0 %v409_v63  ;;  %2054 = vmatpush2.msra.mxu1 %v409_v63  ;;  %v359_v63 = vld [vmem:[#allocation5 + $0x170] sm:$0xff] }
  0x8d   : > { %569 = vmatprep.mubr.f32.mxu0 %v2486_v0  ;;  %713 = vmatprep.mubr.f32.mxu1 %v266_v1  ;;  %v2556_v1 = vld [vmem:[%s2475_s8 + $0x78] sm:$0xff] }
  0x8e   : > { %570 = vmatmul.mubr.f32.vlgmr.msra.gmra.mxu0 %v2490_v2  ;;  %714 = vmatmul.mubr.f32.vlgmr.msra.gmra.mxu1 %v265_v3  ;;  %v280_v3 = vld [vmem:[%s2475_s8 + $0x1f8] sm:$0xff] }
  0x8f   : > { %858 = vmatprep.subr.mxu1 %v406_v4  ;;  %1211 = vmatprep.subr.mxu0 %v408_v5  ;;  %v352_v4 = vld [vmem:[#allocation5 + $0x138] sm:$0xff]  ;;  %v354_v5 = vld [vmem:[#allocation5 + $0x148] sm:$0xff] }
  0x90   : > { %859 = vmatpush1.msra.mxu1 %v405_v6  ;;  %1212 = vmatpush1.msra.mxu0 %v407_v7  ;;  %v2560_v6 = vld [vmem:[%s2475_s8 + $0x70] sm:$0xff] }
  0x91   : > { %575 = vmatprep.mubr.f32.mxu0 %v2496_v8  ;;  %719 = vmatprep.mubr.f32.mxu1 %v268_v9  ;;  %v279_v7 = vld [vmem:[%s2475_s8 + $0x1f0] sm:$0xff] }
  0x92   : > { %860 = vmatprep.subr.mxu1 %v400_v10  ;;  %1213 = vmatprep.subr.mxu0 %v402_v11  ;;  %v351_v9 = vld [vmem:[#allocation5 + $0x130] sm:$0xff]  ;;  %v353_v10 = vld [vmem:[#allocation5 + $0x140] sm:$0xff]  ;;  %v346_v11 = vld [vmem:[#allocation5 + $0x108] sm:$0xff] }
  0x93   : > { %576 = vmatmul.mubr.f32.gmra.mxu0 %v2500_v12  ;;  %720 = vmatmul.mubr.f32.gmra.mxu1 %v267_v13  ;;  %v348_v13 = vld [vmem:[#allocation5 + $0x118] sm:$0xff] }
  0x94   : > { %861 = vmatpush1.msra.mxu1 %v399_v14  ;;  %1214 = vmatpush1.msra.mxu0 %v401_v15  ;;  %v2566_v14 = vld [vmem:[%s2475_s8 + $0x88] sm:$0xff] }
  0x95   : > { %862 = vmatprep.subr.mxu1 %v394_v16  ;;  %1215 = vmatprep.subr.mxu0 %v396_v17  ;;  %v2569_v15 = vld [vmem:[%s2475_s8 + $0x208] sm:$0xff]  ;;  %v345_v16 = vld [vmem:[#allocation5 + $0x100] sm:$0xff]  ;;  %v347_v17 = vld [vmem:[#allocation5 + $0x110] sm:$0xff] }
  0x96   : > { %581 = vmatprep.mubr.f32.mxu0 %v2506_v18  ;;  %725 = vmatprep.mubr.f32.mxu1 %v270_v19  ;;  %v2572_v19 = vld [vmem:[%s2475_s8 + $0x80] sm:$0xff] }
  0x97   : > { %863 = vmatpush1.msra.mxu1 %v393_v20  ;;  %1216 = vmatpush1.msra.mxu0 %v395_v21  ;;  %v2575_v20 = vld [vmem:[%s2475_s8 + $0x200] sm:$0xff]  ;;  %v340_v21 = vld [vmem:[#allocation5 + $0xd8] sm:$0xff] }
  0x98   : > { %582 = vmatmul.mubr.f32.gmra.mxu0 %v2510_v22  ;;  %726 = vmatmul.mubr.f32.gmra.mxu1 %v269_v23  ;;  %v342_v23 = vld [vmem:[#allocation5 + $0xe8] sm:$0xff] }
  0x99   : > { %864 = vmatprep.subr.mxu1 %v388_v24  ;;  %1217 = vmatprep.subr.mxu0 %v390_v25  ;;  %v339_v24 = vld [vmem:[#allocation5 + $0xd0] sm:$0xff]  ;;  %v341_v25 = vld [vmem:[#allocation5 + $0xe0] sm:$0xff] }
  0x9a   : > { %865 = vmatpush1.msra.mxu1 %v387_v26  ;;  %1218 = vmatpush1.msra.mxu0 %v389_v27  ;;  %v2582_v26 = vld [vmem:[%s2475_s8 + $0x98] sm:$0xff] }
  0x9b   : > { %587 = vmatprep.mubr.f32.mxu0 %v2516_v28  ;;  %731 = vmatprep.mubr.f32.mxu1 %v272_v29  ;;  %v2585_v27 = vld [vmem:[%s2475_s8 + $0x218] sm:$0xff]  ;;  %v2588_v29 = vld [vmem:[%s2475_s8 + $0x90] sm:$0xff] }
  0x9c   : > { %588 = vmatmul.mubr.f32.gmra.mxu0 %v2520_v30  ;;  %732 = vmatmul.mubr.f32.gmra.mxu1 %v271_v31  ;;  %v2591_v31 = vld [vmem:[%s2475_s8 + $0x210] sm:$0xff] }
  0x9d   : > { %866 = vmatprep.subr.mxu1 %v382_v32  ;;  %1219 = vmatprep.subr.mxu0 %v384_v33  ;;  %v334_v32 = vld [vmem:[#allocation5 + $0xa8] sm:$0xff]  ;;  %v336_v33 = vld [vmem:[#allocation5 + $0xb8] sm:$0xff] }
  0x9e   : > { %867 = vmatpush1.msra.mxu1 %v381_v34  ;;  %1220 = vmatpush1.msra.mxu0 %v383_v35  ;;  %v333_v34 = vld [vmem:[#allocation5 + $0xa0] sm:$0xff]  ;;  %v335_v35 = vld [vmem:[#allocation5 + $0xb0] sm:$0xff] }
  0x9f   : > { %593 = vmatprep.mubr.f32.mxu0 %v2526_v36  ;;  %737 = vmatprep.mubr.f32.mxu1 %v274_v37  ;;  %v2598_v37 = vld [vmem:[%s2475_s8 + $0xa8] sm:$0xff] }
  0xa0   : > { %868 = vmatprep.subr.mxu1 %v376_v38  ;;  %1221 = vmatprep.subr.mxu0 %v378_v39  ;;  %v2601_v38 = vld [vmem:[%s2475_s8 + $0x228] sm:$0xff]  ;;  %v328_v39 = vld [vmem:[#allocation5 + $0x78] sm:$0xff] }
  0xa1   : > { %594 = vmatmul.mubr.f32.gmra.mxu0 %v2530_v40  ;;  %738 = vmatmul.mubr.f32.gmra.mxu1 %v273_v41  ;;  %3423 = vst [vmem:[#allocation15_spill] sm:$0xff] %v2601_v38  ;;  %v330_v41 = vld [vmem:[#allocation5 + $0x88] sm:$0xff] }
  0xa2   : > { %869 = vmatpush1.msra.mxu1 %v375_v42  ;;  %1222 = vmatpush1.msra.mxu0 %v377_v43  ;;  %v2604_v42 = vld [vmem:[%s2475_s8 + $0xa0] sm:$0xff] }
  0xa3   : > { %870 = vmatprep.subr.mxu1 %v370_v44  ;;  %1223 = vmatprep.subr.mxu0 %v372_v45  ;;  %v2607_v43 = vld [vmem:[%s2475_s8 + $0x220] sm:$0xff]  ;;  %v327_v44 = vld [vmem:[#allocation5 + $0x70] sm:$0xff] }
  0xa4   : > { %599 = vmatprep.mubr.f32.mxu0 %v2536_v46  ;;  %743 = vmatprep.mubr.f32.mxu1 %v276_v47  ;;  %3424 = vst [vmem:[#allocation16_spill] sm:$0xff] %v2607_v43  ;;  %v329_v45 = vld [vmem:[#allocation5 + $0x80] sm:$0xff]  ;;  %v322_v47 = vld [vmem:[#allocation5 + $0x48] sm:$0xff] }
  0xa5   : > { %871 = vmatpush1.msra.mxu1 %v369_v48  ;;  %1224 = vmatpush1.msra.mxu0 %v371_v49  ;;  %v324_v48 = vld [vmem:[#allocation5 + $0x58] sm:$0xff] }
  0xa6   : > { %600 = vmatmul.mubr.f32.gmra.mxu0 %v2540_v50  ;;  %744 = vmatmul.mubr.f32.gmra.mxu1 %v275_v51  ;;  %v2614_v49 = vld [vmem:[%s2475_s8 + $0xb8] sm:$0xff] }
  0xa7   : > { %872 = vmatprep.subr.mxu1 %v364_v52  ;;  %1225 = vmatprep.subr.mxu0 %v366_v53  ;;  %v2617_v51 = vld [vmem:[%s2475_s8 + $0x238] sm:$0xff]  ;;  %v321_v52 = vld [vmem:[#allocation5 + $0x40] sm:$0xff]  ;;  %v323_v53 = vld [vmem:[#allocation5 + $0x50] sm:$0xff] }
  0xa8   : > { %873 = vmatpush1.msra.mxu1 %v363_v54  ;;  %1226 = vmatpush1.msra.mxu0 %v365_v55  ;;  %3425 = vst [vmem:[#allocation17_spill] sm:$0xff] %v2617_v51  ;;  %v2620_v54 = vld [vmem:[%s2475_s8 + $0xb0] sm:$0xff] }
  0xa9   : > { %605 = vmatprep.mubr.f32.mxu0 %v2546_v56  ;;  %749 = vmatprep.mubr.f32.mxu1 %v278_v57  ;;  %v2623_v55 = vld [vmem:[%s2475_s8 + $0x230] sm:$0xff]  ;;  %v316_v57 = vld [vmem:[#allocation5 + $0x18] sm:$0xff] }
  0xaa   : > { %606 = vmatmul.mubr.f32.gmra.mxu0 %v2550_v58  ;;  %750 = vmatmul.mubr.f32.gmra.mxu1 %v277_v59  ;;  %3426 = vst [vmem:[#allocation18_spill] sm:$0xff] %v2623_v55  ;;  %v318_v59 = vld [vmem:[#allocation5 + $0x28] sm:$0xff] }
  0xab   : > { %874 = vmatprep.subr.mxu1 %v358_v60  ;;  %1227 = vmatprep.subr.mxu0 %v360_v61  ;;  %v315_v60 = vld [vmem:[#allocation5 + $0x10] sm:$0xff]  ;;  %v317_v61 = vld [vmem:[#allocation5 + $0x20] sm:$0xff] }
  0xac   : > { %875 = vmatpush1.msra.mxu1 %v357_v62  ;;  %1228 = vmatpush1.msra.mxu0 %v359_v63  ;;  %v2630_v62 = vld [vmem:[%s2475_s8 + $0xc8] sm:$0xff] }
  0xad   : > { %611 = vmatprep.mubr.f32.mxu0 %v2556_v1  ;;  %755 = vmatprep.mubr.f32.mxu1 %v280_v3  ;;  %v2633_v63 = vld [vmem:[%s2475_s8 + $0x248] sm:$0xff]  ;;  %v2636_v3 = vld [vmem:[%s2475_s8 + $0xc0] sm:$0xff] }
  0xae   : > { %876 = vmatprep.subr.mxu1 %v352_v4  ;;  %1229 = vmatprep.subr.mxu0 %v354_v5  ;;  %3427 = vst [vmem:[#allocation19_spill] sm:$0xff] %v2633_v63  ;;  %v2639_v4 = vld [vmem:[%s2475_s8 + $0x240] sm:$0xff]  ;;  %v502_v5 = vld [vmem:[#allocation5 + $0x5e8] sm:$0xff] }
  0xaf   : > { %612 = vmatmul.mubr.f32.gmra.mxu0 %v2560_v6  ;;  %756 = vmatmul.mubr.f32.gmra.mxu1 %v279_v7  ;;  %3428 = vst [vmem:[#allocation20_spill] sm:$0xff] %v2639_v4  ;;  %v504_v7 = vld [vmem:[#allocation5 + $0x5f8] sm:$0xff] }
  0xb0   : > { %877 = vmatpush1.msra.mxu1 %v351_v9  ;;  %1230 = vmatpush1.msra.mxu0 %v353_v10  ;;  %v501_v9 = vld [vmem:[#allocation5 + $0x5e0] sm:$0xff]  ;;  %v503_v10 = vld [vmem:[#allocation5 + $0x5f0] sm:$0xff] }
  0xb1   : > { %878 = vmatprep.subr.mxu1 %v346_v11  ;;  %1231 = vmatprep.subr.mxu0 %v348_v13  ;;  %v2646_v11 = vld [vmem:[%s2475_s8 + $0xd8] sm:$0xff] }
  0xb2   : > { %617 = vmatprep.mubr.f32.mxu0 %v2566_v14  ;;  %761 = vmatprep.mubr.f32.mxu1 %v2569_v15  ;;  %v2649_v13 = vld [vmem:[%s2475_s8 + $0x258] sm:$0xff] }
  0xb3   : > { %879 = vmatpush1.msra.mxu1 %v345_v16  ;;  %1232 = vmatpush1.msra.mxu0 %v347_v17  ;;  %3429 = vst [vmem:[#allocation21_spill] sm:$0xff] %v2649_v13  ;;  %v496_v16 = vld [vmem:[#allocation5 + $0x5b8] sm:$0xff]  ;;  %v498_v17 = vld [vmem:[#allocation5 + $0x5c8] sm:$0xff] }
  0xb4   : > { %618 = vmatmul.mubr.f32.gmra.mxu0 %v2572_v19  ;;  %762 = vmatmul.mubr.f32.gmra.mxu1 %v2575_v20 }
  0xb5   : > { %880 = vmatprep.subr.mxu1 %v340_v21  ;;  %1233 = vmatprep.subr.mxu0 %v342_v23  ;;  %v2652_v21 = vld [vmem:[%s2475_s8 + $0xd0] sm:$0xff] }
  0xb6   : > { %881 = vmatpush1.msra.mxu1 %v339_v24  ;;  %1234 = vmatpush1.msra.mxu0 %v341_v25  ;;  %v2655_v23 = vld [vmem:[%s2475_s8 + $0x250] sm:$0xff]  ;;  %v497_v25 = vld [vmem:[#allocation5 + $0x5c0] sm:$0xff] }
  0xb7   : > { %623 = vmatprep.mubr.f32.mxu0 %v2582_v26  ;;  %767 = vmatprep.mubr.f32.mxu1 %v2585_v27  ;;  %3430 = vst [vmem:[#allocation22_spill] sm:$0xff] %v2655_v23  ;;  %v495_v24 = vld [vmem:[#allocation5 + $0x5b0] sm:$0xff] }
  0xb8   : > { %624 = vmatmul.mubr.f32.gmra.mxu0 %v2588_v29  ;;  %768 = vmatmul.mubr.f32.gmra.mxu1 %v2591_v31 }
  0xb9   : > { %882 = vmatprep.subr.mxu1 %v334_v32  ;;  %1235 = vmatprep.subr.mxu0 %v336_v33  ;;  %v490_v32 = vld [vmem:[#allocation5 + $0x588] sm:$0xff]  ;;  %v492_v33 = vld [vmem:[#allocation5 + $0x598] sm:$0xff] }
  0xba   : > { %883 = vmatpush1.msra.mxu1 %v333_v34  ;;  %1236 = vmatpush1.msra.mxu0 %v335_v35  ;;  %v2662_v34 = vld [vmem:[%s2475_s8 + $0xe8] sm:$0xff] }
  0xbb   : > { %629 = vmatprep.mubr.f32.mxu0 %v2598_v37  ;;  %773 = vmatprep.mubr.f32.mxu1 %v2601_v38  ;;  %v2665_v35 = vld [vmem:[%s2475_s8 + $0x268] sm:$0xff]  ;;  %v413_v38 = vld [vmem:[#allocation5 + $0x320] sm:$0xff] }
  0xbc   : > { %884 = vmatprep.subr.mxu1 %v328_v39  ;;  %1237 = vmatprep.subr.mxu0 %v330_v41  ;;  %3431 = vst [vmem:[#allocation23_spill] sm:$0xff] %v2665_v35  ;;  %v489_v39 = vld [vmem:[#allocation5 + $0x580] sm:$0xff]  ;;  %v491_v41 = vld [vmem:[#allocation5 + $0x590] sm:$0xff] }
  0xbd   : > { %630 = vmatmul.mubr.f32.gmra.mxu0 %v2604_v42  ;;  %774 = vmatmul.mubr.f32.gmra.mxu1 %v2607_v43  ;;  %v411_v43 = vld [vmem:[#allocation5 + $0x310] sm:$0xff] }
  0xbe   : > { %885 = vmatpush1.msra.mxu1 %v327_v44  ;;  %1238 = vmatpush1.msra.mxu0 %v329_v45  ;;  %v2668_v44 = vld [vmem:[%s2475_s8 + $0xe0] sm:$0xff] }
  0xbf   : > { %886 = vmatprep.subr.mxu1 %v322_v47  ;;  %1239 = vmatprep.subr.mxu0 %v324_v48  ;;  %v2671_v45 = vld [vmem:[%s2475_s8 + $0x260] sm:$0xff]  ;;  %v484_v47 = vld [vmem:[#allocation5 + $0x558] sm:$0xff]  ;;  %v486_v48 = vld [vmem:[#allocation5 + $0x568] sm:$0xff] }
  0xc0   : > { %635 = vmatprep.mubr.f32.mxu0 %v2614_v49  ;;  %779 = vmatprep.mubr.f32.mxu1 %v2617_v51  ;;  %3432 = vst [vmem:[#allocation24_spill] sm:$0xff] %v2671_v45  ;;  %v2812_v51 = vld [vmem:[%s2475_s8 + $0x170] sm:$0xff] }
  0xc1   : > { %887 = vmatpush1.msra.mxu1 %v321_v52  ;;  %1240 = vmatpush1.msra.mxu0 %v323_v53  ;;  %v483_v52 = vld [vmem:[#allocation5 + $0x550] sm:$0xff]  ;;  %v485_v53 = vld [vmem:[#allocation5 + $0x560] sm:$0xff] }
  0xc2   : > { %636 = vmatmul.mubr.f32.gmra.mxu0 %v2620_v54  ;;  %780 = vmatmul.mubr.f32.gmra.mxu1 %v2623_v55  ;;  %v417_v55 = vld [vmem:[#allocation5 + $0x340] sm:$0xff] }
  0xc3   : > { %888 = vmatprep.subr.mxu1 %v316_v57  ;;  %1241 = vmatprep.subr.mxu0 %v318_v59  ;;  %v2678_v57 = vld [vmem:[%s2475_s8 + $0xf8] sm:$0xff] }
  0xc4   : > { %889 = vmatpush1.msra.mxu1 %v315_v60  ;;  %1242 = vmatpush1.msra.mxu0 %v317_v61  ;;  %v2681_v59 = vld [vmem:[%s2475_s8 + $0x278] sm:$0xff]  ;;  %v2684_v60 = vld [vmem:[%s2475_s8 + $0xf0] sm:$0xff] }
  0xc5   : > { %641 = vmatprep.mubr.f32.mxu0 %v2630_v62  ;;  %785 = vmatprep.mubr.f32.mxu1 %v2633_v63  ;;  %3433 = vst [vmem:[#allocation25_spill] sm:$0xff] %v2681_v59  ;;  %v2687_v61 = vld [vmem:[%s2475_s8 + $0x270] sm:$0xff]  ;;  %v425_v63 = vld [vmem:[#allocation5 + $0x380] sm:$0xff] }
  0xc6   : > { %642 = vmatmul.mubr.f32.gmra.mxu0 %v2636_v3  ;;  %786 = vmatmul.mubr.f32.gmra.mxu1 %v2639_v4  ;;  %3434 = vst [vmem:[#allocation26_spill] sm:$0xff] %v2687_v61  ;;  %v2796_v4 = vld [vmem:[%s2475_s8 + $0x160] sm:$0xff] }
  0xc7   : > { %890 = vmatprep.subr.mxu1 %v502_v5  ;;  %1243 = vmatprep.subr.mxu0 %v504_v7  ;;  %v478_v5 = vld [vmem:[#allocation5 + $0x528] sm:$0xff]  ;;  %v480_v7 = vld [vmem:[#allocation5 + $0x538] sm:$0xff] }
  0xc8   : > { %891 = vmatpush2.msra.mxu1 %v501_v9  ;;  %1244 = vmatpush2.msra.mxu0 %v503_v10  ;;  %v477_v9 = vld [vmem:[#allocation5 + $0x520] sm:$0xff]  ;;  %v479_v10 = vld [vmem:[#allocation5 + $0x530] sm:$0xff] }
  0xc9   : > { %647 = vmatprep.mubr.f32.mxu0 %v2646_v11  ;;  %791 = vmatprep.mubr.f32.mxu1 %v2649_v13  ;;  %v431_v13 = vld [vmem:[#allocation5 + $0x3b0] sm:$0xff] }
  0xca   : > { %892 = vmatprep.subr.mxu1 %v496_v16  ;;  %1245 = vmatprep.subr.mxu0 %v498_v17  ;;  %v2694_v16 = vld [vmem:[%s2475_s8 + $0x108] sm:$0xff] }
  0xcb   : > { %648 = vmatmul.mubr.f32.gmra.mxu0 %v2652_v21  ;;  %792 = vmatmul.mubr.f32.gmra.mxu1 %v2655_v23  ;;  %v2697_v17 = vld [vmem:[%s2475_s8 + $0x288] sm:$0xff]  ;;  %v2780_v23 = vld [vmem:[%s2475_s8 + $0x150] sm:$0xff] }
  0xcc   : > { %893 = vmatpush2.msra.mxu1 %v495_v24  ;;  %1246 = vmatpush2.msra.mxu0 %v497_v25  ;;  %3435 = vst [vmem:[#allocation27_spill] sm:$0xff] %v2697_v17  ;;  %v472_v24 = vld [vmem:[#allocation5 + $0x4f8] sm:$0xff]  ;;  %v474_v25 = vld [vmem:[#allocation5 + $0x508] sm:$0xff] }
  0xcd   : > { %894 = vmatprep.subr.mxu1 %v490_v32  ;;  %1247 = vmatprep.subr.mxu0 %v492_v33  ;;  %v2700_v32 = vld [vmem:[%s2475_s8 + $0x100] sm:$0xff] }
  0xce   : > { %653 = vmatprep.mubr.f32.mxu0 %v2662_v34  ;;  %797 = vmatprep.mubr.f32.mxu1 %v2665_v35  ;;  %v2703_v33 = vld [vmem:[%s2475_s8 + $0x280] sm:$0xff]  ;;  %v438_v35 = vld [vmem:[#allocation5 + $0x3e8] sm:$0xff] }
  0xcf   : > { %895 = vmatpush2.msra.mxu1 %v489_v39  ;;  %1248 = vmatpush2.msra.mxu0 %v491_v41  ;;  %3436 = vst [vmem:[#allocation28_spill] sm:$0xff] %v2703_v33  ;;  %v471_v39 = vld [vmem:[#allocation5 + $0x4f0] sm:$0xff]  ;;  %v473_v41 = vld [vmem:[#allocation5 + $0x500] sm:$0xff] }
  0xd0   : > { %654 = vmatmul.mubr.f32.gmra.mxu0 %v2668_v44  ;;  %798 = vmatmul.mubr.f32.gmra.mxu1 %v2671_v45  ;;  %v441_v45 = vld [vmem:[#allocation5 + $0x400] sm:$0xff] }
  0xd1   : > { %896 = vmatprep.subr.mxu1 %v484_v47  ;;  %1249 = vmatprep.subr.mxu0 %v486_v48  ;;  %v466_v47 = vld [vmem:[#allocation5 + $0x4c8] sm:$0xff]  ;;  %v468_v48 = vld [vmem:[#allocation5 + $0x4d8] sm:$0xff] }
  0xd2   : > { %897 = vmatpush2.msra.mxu1 %v483_v52  ;;  %1250 = vmatpush2.msra.mxu0 %v485_v53  ;;  %v2710_v52 = vld [vmem:[%s2475_s8 + $0x118] sm:$0xff] }
  0xd3   : > { %659 = vmatprep.mubr.f32.mxu0 %v2678_v57  ;;  %803 = vmatprep.mubr.f32.mxu1 %v2681_v59  ;;  %v2713_v53 = vld [vmem:[%s2475_s8 + $0x298] sm:$0xff]  ;;  %v449_v59 = vld [vmem:[#allocation5 + $0x440] sm:$0xff] }
  0xd4   : > { %660 = vmatmul.mubr.f32.gmra.mxu0 %v2684_v60  ;;  %804 = vmatmul.mubr.f32.gmra.mxu1 %v2687_v61  ;;  %3437 = vst [vmem:[#allocation29_spill] sm:$0xff] %v2713_v53  ;;  %v2748_v61 = vld [vmem:[%s2475_s8 + $0x130] sm:$0xff] }
  0xd5   : > { %898 = vmatprep.subr.mxu1 %v478_v5  ;;  %1251 = vmatprep.subr.mxu0 %v480_v7  ;;  %v465_v5 = vld [vmem:[#allocation5 + $0x4c0] sm:$0xff]  ;;  %v467_v7 = vld [vmem:[#allocation5 + $0x4d0] sm:$0xff] }
  0xd6   : > { %899 = vmatpush2.msra.mxu1 %v477_v9  ;;  %1252 = vmatpush2.msra.mxu0 %v479_v10  ;;  %v2716_v9 = vld [vmem:[%s2475_s8 + $0x110] sm:$0xff] }
  0xd7   : > { %665 = vmatprep.mubr.f32.mxu0 %v2694_v16  ;;  %809 = vmatprep.mubr.f32.mxu1 %v2697_v17  ;;  %v2719_v10 = vld [vmem:[%s2475_s8 + $0x290] sm:$0xff] }
  0xd8   : > { %900 = vmatprep.subr.mxu1 %v472_v24  ;;  %1253 = vmatprep.subr.mxu0 %v474_v25  ;;  %3438 = vst [vmem:[#allocation30_spill] sm:$0xff] %v2719_v10  ;;  %v460_v24 = vld [vmem:[#allocation5 + $0x498] sm:$0xff]  ;;  %v462_v25 = vld [vmem:[#allocation5 + $0x4a8] sm:$0xff]  ;;  %v455_v17 = vld [vmem:[#allocation5 + $0x470] sm:$0xff] }
  0xd9   : > { %666 = vmatmul.mubr.f32.gmra.mxu0 %v2700_v32  ;;  %810 = vmatmul.mubr.f32.gmra.mxu1 %v2703_v33  ;;  %v2732_v33 = vld [vmem:[%s2475_s8 + $0x120] sm:$0xff] }
  0xda   : > { %901 = vmatpush2.msra.mxu1 %v471_v39  ;;  %1254 = vmatpush2.msra.mxu0 %v473_v41  ;;  %v459_v39 = vld [vmem:[#allocation5 + $0x490] sm:$0xff]  ;;  %v461_v41 = vld [vmem:[#allocation5 + $0x4a0] sm:$0xff] }
  0xdb   : > { %902 = vmatprep.subr.mxu1 %v466_v47  ;;  %1255 = vmatprep.subr.mxu0 %v468_v48  ;;  %v2726_v47 = vld [vmem:[%s2475_s8 + $0x128] sm:$0xff] }
  0xdc   : > { %671 = vmatprep.mubr.f32.mxu0 %v2710_v52  ;;  %815 = vmatprep.mubr.f32.mxu1 %v2713_v53  ;;  %v2729_v48 = vld [vmem:[%s2475_s8 + $0x2a8] sm:$0xff]  ;;  %v2735_v53 = vld [vmem:[%s2475_s8 + $0x2a0] sm:$0xff] }
  0xdd   : > { %903 = vmatpush2.msra.mxu1 %v465_v5  ;;  %1256 = vmatpush2.msra.mxu0 %v467_v7  ;;  %3439 = vst [vmem:[#allocation31_spill] sm:$0xff] %v2729_v48  ;;  %3440 = vst [vmem:[#allocation32_spill] sm:$0xff] %v2735_v53  ;;  %v454_v5 = vld [vmem:[#allocation5 + $0x468] sm:$0xff]  ;;  %v456_v7 = vld [vmem:[#allocation5 + $0x478] sm:$0xff] }
  0xde   : > { %672 = vmatmul.mubr.f32.gmra.mxu0 %v2716_v9  ;;  %816 = vmatmul.mubr.f32.gmra.mxu1 %v2719_v10  ;;  %v453_v10 = vld [vmem:[#allocation5 + $0x460] sm:$0xff] }
  0xdf   : > { %904 = vmatprep.subr.mxu1 %v460_v24  ;;  %1257 = vmatprep.subr.mxu0 %v462_v25  ;;  %v2742_v24 = vld [vmem:[%s2475_s8 + $0x138] sm:$0xff] }
  0xe0   : > { %905 = vmatpush2.msra.mxu1 %v459_v39  ;;  %1258 = vmatpush2.msra.mxu0 %v461_v41  ;;  %v2745_v25 = vld [vmem:[%s2475_s8 + $0x2b8] sm:$0xff]  ;;  %v450_v41 = vld [vmem:[#allocation5 + $0x448] sm:$0xff] }
  0xe1   : > { %677 = vmatprep.mubr.f32.mxu0 %v2726_v47  ;;  %821 = vmatprep.mubr.f32.mxu1 %v2729_v48  ;;  %3441 = vst [vmem:[#allocation33_spill] sm:$0xff] %v2745_v25  ;;  %v448_v39 = vld [vmem:[#allocation5 + $0x438] sm:$0xff]  ;;  %v2751_v48 = vld [vmem:[%s2475_s8 + $0x2b0] sm:$0xff] }
  0xe2   : > { %678 = vmatmul.mubr.f32.gmra.mxu0 %v2732_v33  ;;  %822 = vmatmul.mubr.f32.gmra.mxu1 %v2735_v53  ;;  %3442 = vst [vmem:[#allocation34_spill] sm:$0xff] %v2751_v48  ;;  %v447_v53 = vld [vmem:[#allocation5 + $0x430] sm:$0xff] }
  0xe3   : > { %906 = vmatprep.subr.mxu1 %v454_v5  ;;  %1259 = vmatprep.subr.mxu0 %v456_v7  ;;  %v442_v5 = vld [vmem:[#allocation5 + $0x408] sm:$0xff]  ;;  %v444_v7 = vld [vmem:[#allocation5 + $0x418] sm:$0xff] }
  0xe4   : > { %907 = vmatpush2.msra.mxu1 %v453_v10  ;;  %1260 = vmatpush2.msra.mxu0 %v455_v17  ;;  %v2758_v17 = vld [vmem:[%s2475_s8 + $0x148] sm:$0xff] }
  0xe5   : > { %683 = vmatprep.mubr.f32.mxu0 %v2742_v24  ;;  %827 = vmatprep.mubr.f32.mxu1 %v2745_v25  ;;  %v2761_v10 = vld [vmem:[%s2475_s8 + $0x2c8] sm:$0xff]  ;;  %v443_v25 = vld [vmem:[#allocation5 + $0x410] sm:$0xff] }
  0xe6   : > { %908 = vmatprep.subr.mxu1 %v448_v39  ;;  %1261 = vmatprep.subr.mxu0 %v450_v41  ;;  %3443 = vst [vmem:[#allocation35_spill] sm:$0xff] %v2761_v10  ;;  %v2764_v39 = vld [vmem:[%s2475_s8 + $0x140] sm:$0xff] }
  0xe7   : > { %684 = vmatmul.mubr.f32.gmra.mxu0 %v2748_v61  ;;  %828 = vmatmul.mubr.f32.gmra.mxu1 %v2751_v48  ;;  %v2767_v41 = vld [vmem:[%s2475_s8 + $0x2c0] sm:$0xff]  ;;  %v436_v48 = vld [vmem:[#allocation5 + $0x3d8] sm:$0xff] }
  0xe8   : > { %909 = vmatpush2.msra.mxu1 %v447_v53  ;;  %1262 = vmatpush2.msra.mxu0 %v449_v59  ;;  %3444 = vst [vmem:[#allocation36_spill] sm:$0xff] %v2767_v41  ;;  %v435_v59 = vld [vmem:[#allocation5 + $0x3d0] sm:$0xff]  ;;  %v437_v53 = vld [vmem:[#allocation5 + $0x3e0] sm:$0xff] }
  0xe9   : > { %910 = vmatprep.subr.mxu1 %v442_v5  ;;  %1263 = vmatprep.subr.mxu0 %v444_v7  ;;  %v2774_v5 = vld [vmem:[%s2475_s8 + $0x158] sm:$0xff] }
  0xea   : > { %689 = vmatprep.mubr.f32.mxu0 %v2758_v17  ;;  %833 = vmatprep.mubr.f32.mxu1 %v2761_v10  ;;  %v2777_v7 = vld [vmem:[%s2475_s8 + $0x2d8] sm:$0xff]  ;;  %v2783_v10 = vld [vmem:[%s2475_s8 + $0x2d0] sm:$0xff] }
  0xeb   : > { %911 = vmatpush2.msra.mxu1 %v441_v45  ;;  %1264 = vmatpush2.msra.mxu0 %v443_v25  ;;  %3445 = vst [vmem:[#allocation37_spill] sm:$0xff] %v2777_v7  ;;  %3446 = vst [vmem:[#allocation38_spill] sm:$0xff] %v2783_v10  ;;  %v430_v45 = vld [vmem:[#allocation5 + $0x3a8] sm:$0xff]  ;;  %v432_v25 = vld [vmem:[#allocation5 + $0x3b8] sm:$0xff] }
  0xec   : > { %690 = vmatmul.mubr.f32.gmra.mxu0 %v2764_v39  ;;  %834 = vmatmul.mubr.f32.gmra.mxu1 %v2767_v41  ;;  %v429_v41 = vld [vmem:[#allocation5 + $0x3a0] sm:$0xff] }
  0xed   : > { %912 = vmatprep.subr.mxu1 %v436_v48  ;;  %1265 = vmatprep.subr.mxu0 %v438_v35  ;;  %v2790_v35 = vld [vmem:[%s2475_s8 + $0x168] sm:$0xff] }
  0xee   : > { %913 = vmatpush2.msra.mxu1 %v435_v59  ;;  %1266 = vmatpush2.msra.mxu0 %v437_v53  ;;  %v2793_v48 = vld [vmem:[%s2475_s8 + $0x2e8] sm:$0xff]  ;;  %v424_v59 = vld [vmem:[#allocation5 + $0x378] sm:$0xff] }
  0xef   : > { %695 = vmatprep.mubr.f32.mxu0 %v2774_v5  ;;  %839 = vmatprep.mubr.f32.mxu1 %v2777_v7  ;;  %3447 = vst [vmem:[#allocation39_spill] sm:$0xff] %v2793_v48  ;;  %v426_v53 = vld [vmem:[#allocation5 + $0x388] sm:$0xff]  ;;  %v2799_v7 = vld [vmem:[%s2475_s8 + $0x2e0] sm:$0xff] }
  0xf0   : > { %696 = vmatmul.mubr.f32.gmra.mxu0 %v2780_v23  ;;  %840 = vmatmul.mubr.f32.gmra.mxu1 %v2783_v10  ;;  %3448 = vst [vmem:[#allocation40_spill] sm:$0xff] %v2799_v7  ;;  %v423_v10 = vld [vmem:[#allocation5 + $0x370] sm:$0xff] }
  0xf1   : > { %914 = vmatprep.subr.mxu1 %v430_v45  ;;  %1267 = vmatprep.subr.mxu0 %v432_v25  ;;  %v418_v45 = vld [vmem:[#allocation5 + $0x348] sm:$0xff]  ;;  %v420_v25 = vld [vmem:[#allocation5 + $0x358] sm:$0xff] }
  0xf2   : > { %915 = vmatpush2.msra.mxu1 %v429_v41  ;;  %1268 = vmatpush2.msra.mxu0 %v431_v13  ;;  %v2806_v13 = vld [vmem:[%s2475_s8 + $0x178] sm:$0xff] }
  0xf3   : > { %701 = vmatprep.mubr.f32.mxu0 %v2790_v35  ;;  %845 = vmatprep.mubr.f32.mxu1 %v2793_v48  ;;  %v2809_v41 = vld [vmem:[%s2475_s8 + $0x2f8] sm:$0xff]  ;;  %v419_v48 = vld [vmem:[#allocation5 + $0x350] sm:$0xff] }
  0xf4   : > { %916 = vmatprep.subr.mxu1 %v424_v59  ;;  %1269 = vmatprep.subr.mxu0 %v426_v53  ;;  %v2815_v59 = vld [vmem:[%s2475_s8 + $0x2f0] sm:$0xff]  ;;  %v412_v53 = vld [vmem:[#allocation5 + $0x318] sm:$0xff] }
  0xf5   : > { %702 = vmatmul.mubr.f32.gmra.mxu0 %v2796_v4  ;;  %846 = vmatmul.mubr.f32.gmra.mxu1 %v2799_v7  ;;  %v414_v7 = vld [vmem:[#allocation5 + $0x328] sm:$0xff] }
  0xf6   : > { %917 = vmatpush2.msra.mxu1 %v423_v10  ;;  %1270 = vmatpush2.msra.mxu0 %v425_v63 }
  0xf7   : > { %918 = vmatprep.subr.mxu1 %v418_v45  ;;  %1271 = vmatprep.subr.mxu0 %v420_v25 }
  0xf8   : > { %707 = vmatprep.mubr.f32.mxu0 %v2806_v13  ;;  %851 = vmatprep.mubr.f32.mxu1 %v2809_v41 }
  0xf9   : > { %919 = vmatpush2.msra.mxu1 %v417_v55  ;;  %1272 = vmatpush2.msra.mxu0 %v419_v48  ;;  %v2172_v48 = vld [vmem:[%s2475_s8 + $0x1f0] sm:$0xff] }
  0xfa   : > { %708 = vmatmul.mubr.f32.gmra.mxu0 %v2812_v51  ;;  %852 = vmatmul.mubr.f32.gmra.mxu1 %v2815_v59 }
  0xfb   : > { %920 = vmatprep.subr.mxu1 %v412_v53  ;;  %1273 = vmatprep.subr.mxu0 %v414_v7 }
  0xfc   : > { %921 = vmatpush2.msra.mxu1 %v411_v43  ;;  %1274 = vmatpush2.msra.mxu0 %v413_v38  ;;  %v2160_v38 = vld [vmem:[%s2475_s8 + $0x190] sm:$0xff] }
  0xfd   : > { %922 = vmatprep.mubr.f32.mxu1 %v2486_v0  ;;  %1275 = vmatprep.mubr.f32.mxu0 %v2486_v0 }
  0xfe   : > { %923 = vmatmul.mubr.f32.vlgmr.msra.gmra.mxu1 %v2490_v2  ;;  %1276 = vmatmul.mubr.f32.vlgmr.msra.gmra.mxu0 %v2490_v2 }
  0xff   : > { %928 = vmatprep.mubr.f32.mxu1 %v2496_v8  ;;  %1281 = vmatprep.mubr.f32.mxu0 %v2496_v8 }
 0x102   : > { %929 = vmatmul.mubr.f32.gmra.mxu1 %v2500_v12  ;;  %1282 = vmatmul.mubr.f32.gmra.mxu0 %v2500_v12 }
 0x103   : > { %934 = vmatprep.mubr.f32.mxu1 %v2506_v18  ;;  %1287 = vmatprep.mubr.f32.mxu0 %v2506_v18 }
 0x106   : > { %935 = vmatmul.mubr.f32.gmra.mxu1 %v2510_v22  ;;  %1288 = vmatmul.mubr.f32.gmra.mxu0 %v2510_v22 }
 0x107   : > { %940 = vmatprep.mubr.f32.mxu1 %v2516_v28  ;;  %1293 = vmatprep.mubr.f32.mxu0 %v2516_v28 }
 0x10a   : > { %941 = vmatmul.mubr.f32.gmra.mxu1 %v2520_v30  ;;  %1294 = vmatmul.mubr.f32.gmra.mxu0 %v2520_v30 }
 0x10b   : > { %946 = vmatprep.mubr.f32.mxu1 %v2526_v36  ;;  %1299 = vmatprep.mubr.f32.mxu0 %v2526_v36 }
 0x10e   : > { %947 = vmatmul.mubr.f32.gmra.mxu1 %v2530_v40  ;;  %1300 = vmatmul.mubr.f32.gmra.mxu0 %v2530_v40 }
 0x10f   : > { %952 = vmatprep.mubr.f32.mxu1 %v2536_v46  ;;  %1305 = vmatprep.mubr.f32.mxu0 %v2536_v46 }
 0x112   : > { %953 = vmatmul.mubr.f32.gmra.mxu1 %v2540_v50  ;;  %1306 = vmatmul.mubr.f32.gmra.mxu0 %v2540_v50 }
 0x113   : > { %958 = vmatprep.mubr.f32.mxu1 %v2546_v56  ;;  %1311 = vmatprep.mubr.f32.mxu0 %v2546_v56  ;;  %v2157_v56 = vld [vmem:[%s2475_s8 + $0x188] sm:$0xff] }
 0x116   : > { %959 = vmatmul.mubr.f32.gmra.mxu1 %v2550_v58  ;;  %1312 = vmatmul.mubr.f32.gmra.mxu0 %v2550_v58 }
 0x117   : > { %964 = vmatprep.mubr.f32.mxu1 %v2556_v1  ;;  %1317 = vmatprep.mubr.f32.mxu0 %v2556_v1 }
 0x11a   : > { %965 = vmatmul.mubr.f32.gmra.mxu1 %v2560_v6  ;;  %1318 = vmatmul.mubr.f32.gmra.mxu0 %v2560_v6  ;;  %v2158_v6 = vld [vmem:[%s2475_s8 + $0x180] sm:$0xff] }
 0x11b   : > { %970 = vmatprep.mubr.f32.mxu1 %v2566_v14  ;;  %1323 = vmatprep.mubr.f32.mxu0 %v2566_v14 }
 0x11e   : > { %971 = vmatmul.mubr.f32.gmra.mxu1 %v2572_v19  ;;  %1324 = vmatmul.mubr.f32.gmra.mxu0 %v2572_v19 }
 0x11f   : > { %976 = vmatprep.mubr.f32.mxu1 %v2582_v26  ;;  %1329 = vmatprep.mubr.f32.mxu0 %v2582_v26  ;;  %v2159_v26 = vld [vmem:[%s2475_s8 + $0x198] sm:$0xff] }
 0x122   : > { %977 = vmatmul.mubr.f32.gmra.mxu1 %v2588_v29  ;;  %1330 = vmatmul.mubr.f32.gmra.mxu0 %v2588_v29 }
 0x123   : > { %982 = vmatprep.mubr.f32.mxu1 %v2598_v37  ;;  %1335 = vmatprep.mubr.f32.mxu0 %v2598_v37 }
 0x126   : > { %983 = vmatmul.mubr.f32.gmra.mxu1 %v2604_v42  ;;  %1336 = vmatmul.mubr.f32.gmra.mxu0 %v2604_v42  ;;  %v2161_v42 = vld [vmem:[%s2475_s8 + $0x1a8] sm:$0xff] }
 0x127   : > { %988 = vmatprep.mubr.f32.mxu1 %v2614_v49  ;;  %1341 = vmatprep.mubr.f32.mxu0 %v2614_v49 }
 0x12a   : > { %989 = vmatmul.mubr.f32.gmra.mxu1 %v2620_v54  ;;  %1342 = vmatmul.mubr.f32.gmra.mxu0 %v2620_v54 }
 0x12b   : > { %994 = vmatprep.mubr.f32.mxu1 %v2630_v62  ;;  %1347 = vmatprep.mubr.f32.mxu0 %v2630_v62  ;;  %v2163_v62 = vld [vmem:[%s2475_s8 + $0x1b8] sm:$0xff] }
 0x12e   : > { %995 = vmatmul.mubr.f32.gmra.mxu1 %v2636_v3  ;;  %1348 = vmatmul.mubr.f32.gmra.mxu0 %v2636_v3 }
 0x12f   : > { %1000 = vmatprep.mubr.f32.mxu1 %v2646_v11  ;;  %1353 = vmatprep.mubr.f32.mxu0 %v2646_v11 }
 0x132   : > { %1001 = vmatmul.mubr.f32.gmra.mxu1 %v2652_v21  ;;  %1354 = vmatmul.mubr.f32.gmra.mxu0 %v2652_v21 }
 0x133   : > { %1006 = vmatprep.mubr.f32.mxu1 %v2662_v34  ;;  %1359 = vmatprep.mubr.f32.mxu0 %v2662_v34 }
 0x136   : > { %1007 = vmatmul.mubr.f32.gmra.mxu1 %v2668_v44  ;;  %1360 = vmatmul.mubr.f32.gmra.mxu0 %v2668_v44 }
 0x137   : > { %1012 = vmatprep.mubr.f32.mxu1 %v2678_v57  ;;  %1365 = vmatprep.mubr.f32.mxu0 %v2678_v57  ;;  %v2166_v57 = vld [vmem:[%s2475_s8 + $0x1c0] sm:$0xff] }
 0x13a   : > { %1013 = vmatmul.mubr.f32.gmra.mxu1 %v2684_v60  ;;  %1366 = vmatmul.mubr.f32.gmra.mxu0 %v2684_v60  ;;  %v2167_v60 = vld [vmem:[%s2475_s8 + $0x1d8] sm:$0xff] }
 0x13b   : > { %1018 = vmatprep.mubr.f32.mxu1 %v2694_v16  ;;  %1371 = vmatprep.mubr.f32.mxu0 %v2694_v16 }
 0x13e   : > { %1019 = vmatmul.mubr.f32.gmra.mxu1 %v2700_v32  ;;  %1372 = vmatmul.mubr.f32.gmra.mxu0 %v2700_v32 }
 0x13f   : > { %1024 = vmatprep.mubr.f32.mxu1 %v2710_v52  ;;  %1377 = vmatprep.mubr.f32.mxu0 %v2710_v52  ;;  %v2168_v52 = vld [vmem:[%s2475_s8 + $0x1d0] sm:$0xff] }
 0x142   : > { %1025 = vmatmul.mubr.f32.gmra.mxu1 %v2716_v9  ;;  %1378 = vmatmul.mubr.f32.gmra.mxu0 %v2716_v9  ;;  %v2169_v9 = vld [vmem:[%s2475_s8 + $0x1e8] sm:$0xff] }
 0x143   : > { %1030 = vmatprep.mubr.f32.mxu1 %v2726_v47  ;;  %1383 = vmatprep.mubr.f32.mxu0 %v2726_v47 }
 0x146   : > { %1031 = vmatmul.mubr.f32.gmra.mxu1 %v2732_v33  ;;  %1384 = vmatmul.mubr.f32.gmra.mxu0 %v2732_v33 }
 0x147   : > { %1036 = vmatprep.mubr.f32.mxu1 %v2742_v24  ;;  %1389 = vmatprep.mubr.f32.mxu0 %v2742_v24 }
 0x14a   : > { %1037 = vmatmul.mubr.f32.gmra.mxu1 %v2748_v61  ;;  %1390 = vmatmul.mubr.f32.gmra.mxu0 %v2748_v61 }
 0x14b   : > { %1042 = vmatprep.mubr.f32.mxu1 %v2758_v17  ;;  %1395 = vmatprep.mubr.f32.mxu0 %v2758_v17  ;;  %v2170_v17 = vld [vmem:[%s2475_s8 + $0x1e0] sm:$0xff] }
 0x14e   : > { %1043 = vmatmul.mubr.f32.gmra.mxu1 %v2764_v39  ;;  %1396 = vmatmul.mubr.f32.gmra.mxu0 %v2764_v39  ;;  %v571_v0 = vpop.f32.mrf.mxu0  ;;  %v715_v2 = vpop.f32.mrf.mxu1 }
 0x14f   : > { %1048 = vmatprep.mubr.f32.mxu1 %v2774_v5  ;;  %1401 = vmatprep.mubr.f32.mxu0 %v2774_v5  ;;  %1564 = vst [vmem:[%s2908_s21] sm:$0xff] %v571_v0  ;;  %1708 = vst [vmem:[%s2908_s21 + $0x480] sm:$0xff] %v715_v2  ;;  %v2171_v5 = vld [vmem:[%s2475_s8 + $0x1f8] sm:$0xff] }
 0x150   : > { %v573_v8 = vpop.f32.mrf.mxu0  ;;  %v717_v12 = vpop.f32.mrf.mxu1 }
 0x151   : > { %1565 = vst [vmem:[%s2908_s21 + $0x8] sm:$0xff] %v573_v8  ;;  %1709 = vst [vmem:[%s2908_s21 + $0x488] sm:$0xff] %v717_v12  ;;  %v3449_v12 = vld [vmem:[#allocation15_spill] sm:$0xff] }
 0x152   : > { %1049 = vmatmul.mubr.f32.gmra.mxu1 %v2780_v23  ;;  %1402 = vmatmul.mubr.f32.gmra.mxu0 %v2780_v23  ;;  %v2165_v23 = vld [vmem:[%s2475_s8 + $0x1c8] sm:$0xff] }
 0x153   : > { %1054 = vmatprep.mubr.f32.mxu1 %v2790_v35  ;;  %1407 = vmatprep.mubr.f32.mxu0 %v2790_v35  ;;  %v577_v18 = vpop.f32.mrf.mxu0  ;;  %v721_v22 = vpop.f32.mrf.mxu1 }
 0x154   : > { %1570 = vst [vmem:[%s2908_s21 + $0x30] sm:$0xff] %v577_v18  ;;  %1714 = vst [vmem:[%s2908_s21 + $0x4b0] sm:$0xff] %v721_v22  ;;  %v3450_v22 = vld [vmem:[#allocation16_spill] sm:$0xff] }
 0x155   : > { %v579_v28 = vpop.f32.mrf.mxu0  ;;  %v723_v30 = vpop.f32.mrf.mxu1 }
 0x156   : > { %1055 = vmatmul.mubr.f32.gmra.mxu1 %v2796_v4  ;;  %1408 = vmatmul.mubr.f32.gmra.mxu0 %v2796_v4  ;;  %1571 = vst [vmem:[%s2908_s21 + $0x38] sm:$0xff] %v579_v28  ;;  %1715 = vst [vmem:[%s2908_s21 + $0x4b8] sm:$0xff] %v723_v30  ;;  %v2164_v4 = vld [vmem:[%s2475_s8 + $0x1b0] sm:$0xff] }
 0x157   : > { %1060 = vmatprep.mubr.f32.mxu1 %v2806_v13  ;;  %1413 = vmatprep.mubr.f32.mxu0 %v2806_v13  ;;  %v2173_v13 = vld [vmem:[%s2475_s8 + $0x208] sm:$0xff]  ;;  %v3451_v30 = vld [vmem:[#allocation17_spill] sm:$0xff] }
 0x158   : > { %v583_v36 = vpop.f32.mrf.mxu0  ;;  %v727_v40 = vpop.f32.mrf.mxu1 }
 0x159   : > { %1576 = vst [vmem:[%s2908_s21 + $0x60] sm:$0xff] %v583_v36  ;;  %1720 = vst [vmem:[%s2908_s21 + $0x4e0] sm:$0xff] %v727_v40 }
 0x15a   : > { %1061 = vmatmul.mubr.f32.gmra.mxu1 %v2812_v51  ;;  %1414 = vmatmul.mubr.f32.gmra.mxu0 %v2812_v51  ;;  %v585_v46 = vpop.f32.mrf.mxu0  ;;  %v729_v50 = vpop.f32.mrf.mxu1  ;;  %v2162_v51 = vld [vmem:[%s2475_s8 + $0x1a0] sm:$0xff] }
 0x15b   : > { %1066 = vmatprep.mubr.f32.mxu1 %v2157_v56  ;;  %1419 = vmatprep.mubr.f32.mxu0 %v2157_v56  ;;  %1577 = vst [vmem:[%s2908_s21 + $0x68] sm:$0xff] %v585_v46  ;;  %1721 = vst [vmem:[%s2908_s21 + $0x4e8] sm:$0xff] %v729_v50  ;;  %v3452_v46 = vld [vmem:[#allocation18_spill] sm:$0xff]  ;;  %v3453_v50 = vld [vmem:[#allocation19_spill] sm:$0xff] }
 0x15c   : > { %v589_v58 = vpop.f32.mrf.mxu0  ;;  %v733_v1 = vpop.f32.mrf.mxu1 }
 0x15d   : > { %1582 = vst [vmem:[%s2908_s21 + $0x90] sm:$0xff] %v589_v58  ;;  %1726 = vst [vmem:[%s2908_s21 + $0x510] sm:$0xff] %v733_v1 }
 0x15e   : > { %1067 = vmatmul.mubr.f32.gmra.mxu1 %v2158_v6  ;;  %1420 = vmatmul.mubr.f32.gmra.mxu0 %v2158_v6  ;;  %v591_v14 = vpop.f32.mrf.mxu0  ;;  %v735_v19 = vpop.f32.mrf.mxu1 }
 0x15f   : > { %1072 = vmatprep.mubr.f32.mxu1 %v2159_v26  ;;  %1425 = vmatprep.mubr.f32.mxu0 %v2159_v26  ;;  %1583 = vst [vmem:[%s2908_s21 + $0x98] sm:$0xff] %v591_v14  ;;  %1727 = vst [vmem:[%s2908_s21 + $0x518] sm:$0xff] %v735_v19  ;;  %v3454_v14 = vld [vmem:[#allocation20_spill] sm:$0xff]  ;;  %v3455_v19 = vld [vmem:[#allocation21_spill] sm:$0xff] }
 0x161   : > { %v595_v29 = vpop.f32.mrf.mxu0  ;;  %v739_v37 = vpop.f32.mrf.mxu1 }
 0x162   : > { %1073 = vmatmul.mubr.f32.gmra.mxu1 %v2160_v38  ;;  %1426 = vmatmul.mubr.f32.gmra.mxu0 %v2160_v38  ;;  %1588 = vst [vmem:[%s2908_s21 + $0xc0] sm:$0xff] %v595_v29  ;;  %1732 = vst [vmem:[%s2908_s21 + $0x540] sm:$0xff] %v739_v37  ;;  %v3456_v37 = vld [vmem:[#allocation22_spill] sm:$0xff] }
 0x163   : > { %1078 = vmatprep.mubr.f32.mxu1 %v2161_v42  ;;  %1431 = vmatprep.mubr.f32.mxu0 %v2161_v42  ;;  %v597_v43 = vpop.f32.mrf.mxu0  ;;  %v741_v49 = vpop.f32.mrf.mxu1 }
 0x164   : > { %1589 = vst [vmem:[%s2908_s21 + $0xc8] sm:$0xff] %v597_v43  ;;  %1733 = vst [vmem:[%s2908_s21 + $0x548] sm:$0xff] %v741_v49  ;;  %v3457_v43 = vld [vmem:[#allocation23_spill] sm:$0xff] }
 0x166   : > { %1079 = vmatmul.mubr.f32.gmra.mxu1 %v2162_v51  ;;  %1432 = vmatmul.mubr.f32.gmra.mxu0 %v2162_v51  ;;  %v601_v54 = vpop.f32.mrf.mxu0  ;;  %v745_v55 = vpop.f32.mrf.mxu1 }
 0x167   : > { %1084 = vmatprep.mubr.f32.mxu1 %v2163_v62  ;;  %1437 = vmatprep.mubr.f32.mxu0 %v2163_v62  ;;  %1594 = vst [vmem:[%s2908_s21 + $0xf0] sm:$0xff] %v601_v54  ;;  %1738 = vst [vmem:[%s2908_s21 + $0x570] sm:$0xff] %v745_v55  ;;  %v3458_v54 = vld [vmem:[#allocation24_spill] sm:$0xff] }
 0x168   : > { %v603_v63 = vpop.f32.mrf.mxu0  ;;  %v747_v3 = vpop.f32.mrf.mxu1 }
 0x169   : > { %1595 = vst [vmem:[%s2908_s21 + $0xf8] sm:$0xff] %v603_v63  ;;  %1739 = vst [vmem:[%s2908_s21 + $0x578] sm:$0xff] %v747_v3  ;;  %v3459_v63 = vld [vmem:[#allocation25_spill] sm:$0xff] }
 0x16a   : > { %1085 = vmatmul.mubr.f32.gmra.mxu1 %v2164_v4  ;;  %1438 = vmatmul.mubr.f32.gmra.mxu0 %v2164_v4  ;;  %v607_v11 = vpop.f32.mrf.mxu0  ;;  %v751_v21 = vpop.f32.mrf.mxu1 }
 0x16b   : > { %1090 = vmatprep.mubr.f32.mxu1 %v2165_v23  ;;  %1443 = vmatprep.mubr.f32.mxu0 %v2165_v23  ;;  %1600 = vst [vmem:[%s2908_s21 + $0x120] sm:$0xff] %v607_v11  ;;  %1744 = vst [vmem:[%s2908_s21 + $0x5a0] sm:$0xff] %v751_v21  ;;  %v3460_v11 = vld [vmem:[#allocation26_spill] sm:$0xff]  ;;  %v3461_v21 = vld [vmem:[#allocation27_spill] sm:$0xff] }
 0x16c   : > { %v609_v34 = vpop.f32.mrf.mxu0  ;;  %v753_v44 = vpop.f32.mrf.mxu1 }
 0x16d   : > { %1601 = vst [vmem:[%s2908_s21 + $0x128] sm:$0xff] %v609_v34  ;;  %1745 = vst [vmem:[%s2908_s21 + $0x5a8] sm:$0xff] %v753_v44  ;;  %v3462_v44 = vld [vmem:[#allocation28_spill] sm:$0xff] }
 0x16e   : > { %1091 = vmatmul.mubr.f32.gmra.mxu1 %v2166_v57  ;;  %1444 = vmatmul.mubr.f32.gmra.mxu0 %v2166_v57 }
 0x16f   : > { %1096 = vmatprep.mubr.f32.mxu1 %v2167_v60  ;;  %1449 = vmatprep.mubr.f32.mxu0 %v2167_v60  ;;  %v613_v61 = vpop.f32.mrf.mxu0  ;;  %v757_v16 = vpop.f32.mrf.mxu1 }
 0x170   : > { %1606 = vst [vmem:[%s2908_s21 + $0x150] sm:$0xff] %v613_v61  ;;  %1750 = vst [vmem:[%s2908_s21 + $0x5d0] sm:$0xff] %v757_v16  ;;  %v3463_v61 = vld [vmem:[#allocation29_spill] sm:$0xff] }
 0x171   : > { %v615_v32 = vpop.f32.mrf.mxu0  ;;  %v759_v33 = vpop.f32.mrf.mxu1 }
 0x172   : > { %1097 = vmatmul.mubr.f32.gmra.mxu1 %v2168_v52  ;;  %1450 = vmatmul.mubr.f32.gmra.mxu0 %v2168_v52  ;;  %1607 = vst [vmem:[%s2908_s21 + $0x158] sm:$0xff] %v615_v32  ;;  %1751 = vst [vmem:[%s2908_s21 + $0x5d8] sm:$0xff] %v759_v33  ;;  %v3464_v33 = vld [vmem:[#allocation30_spill] sm:$0xff] }
 0x173   : > { %1102 = vmatprep.mubr.f32.mxu1 %v2169_v9  ;;  %1455 = vmatprep.mubr.f32.mxu0 %v2169_v9 }
 0x174   : > { %v619_v47 = vpop.f32.mrf.mxu0  ;;  %v763_v24 = vpop.f32.mrf.mxu1 }
 0x175   : > { %1612 = vst [vmem:[%s2908_s21 + $0x180] sm:$0xff] %v619_v47  ;;  %1756 = vst [vmem:[%s2908_s21 + $0x600] sm:$0xff] %v763_v24  ;;  %v3465_v47 = vld [vmem:[#allocation31_spill] sm:$0xff] }
 0x176   : > { %1103 = vmatmul.mubr.f32.gmra.mxu1 %v2170_v17  ;;  %1456 = vmatmul.mubr.f32.gmra.mxu0 %v2170_v17  ;;  %v621_v10 = vpop.f32.mrf.mxu0  ;;  %v765_v39 = vpop.f32.mrf.mxu1 }
 0x177   : > { %1108 = vmatprep.mubr.f32.mxu1 %v2171_v5  ;;  %1461 = vmatprep.mubr.f32.mxu0 %v2171_v5  ;;  %1613 = vst [vmem:[%s2908_s21 + $0x188] sm:$0xff] %v621_v10  ;;  %1757 = vst [vmem:[%s2908_s21 + $0x608] sm:$0xff] %v765_v39  ;;  %v3466_v10 = vld [vmem:[#allocation32_spill] sm:$0xff]  ;;  %v3467_v39 = vld [vmem:[#allocation33_spill] sm:$0xff] }
 0x178   : > { %v625_v7 = vpop.f32.mrf.mxu0  ;;  %v769_v35 = vpop.f32.mrf.mxu1 }
 0x179   : > { %1618 = vst [vmem:[%s2908_s21 + $0x1b0] sm:$0xff] %v625_v7  ;;  %1762 = vst [vmem:[%s2908_s21 + $0x630] sm:$0xff] %v769_v35 }
 0x17a   : > { %1109 = vmatmul.mubr.f32.gmra.mxu1 %v2172_v48  ;;  %1462 = vmatmul.mubr.f32.gmra.mxu0 %v2172_v48  ;;  %v627_v45 = vpop.f32.mrf.mxu0  ;;  %v771_v25 = vpop.f32.mrf.mxu1 }
 0x17b   : > { %1114 = vmatprep.mubr.f32.mxu1 %v2569_v15  ;;  %1467 = vmatprep.mubr.f32.mxu0 %v2173_v13  ;;  %1619 = vst [vmem:[%s2908_s21 + $0x1b8] sm:$0xff] %v627_v45  ;;  %1763 = vst [vmem:[%s2908_s21 + $0x638] sm:$0xff] %v771_v25  ;;  %v3468_v45 = vld [vmem:[#allocation34_spill] sm:$0xff]  ;;  %v3469_v25 = vld [vmem:[#allocation35_spill] sm:$0xff] }
 0x17d   : > { %v631_v53 = vpop.f32.mrf.mxu0  ;;  %v775_v0 = vpop.f32.mrf.mxu1 }
 0x17e   : > { %1115 = vmatmul.mubr.f32.gmra.mxu1 %v2575_v20  ;;  %1468 = vmatmul.mubr.f32.gmra.mxu0 %v2575_v20  ;;  %1624 = vst [vmem:[%s2908_s21 + $0x1e0] sm:$0xff] %v631_v53  ;;  %1768 = vst [vmem:[%s2908_s21 + $0x660] sm:$0xff] %v775_v0  ;;  %v3470_v0 = vld [vmem:[#allocation36_spill] sm:$0xff] }
 0x17f   : > { %1120 = vmatprep.mubr.f32.mxu1 %v2585_v27  ;;  %1473 = vmatprep.mubr.f32.mxu0 %v2585_v27  ;;  %v633_v15 = vpop.f32.mrf.mxu0  ;;  %v777_v2 = vpop.f32.mrf.mxu1 }
 0x180   : > { %1625 = vst [vmem:[%s2908_s21 + $0x1e8] sm:$0xff] %v633_v15  ;;  %1769 = vst [vmem:[%s2908_s21 + $0x668] sm:$0xff] %v777_v2 }
 0x182   : > { %1121 = vmatmul.mubr.f32.gmra.mxu1 %v2591_v31  ;;  %1474 = vmatmul.mubr.f32.gmra.mxu0 %v2591_v31  ;;  %v637_v8 = vpop.f32.mrf.mxu0  ;;  %v781_v20 = vpop.f32.mrf.mxu1 }
 0x183   : > { %1126 = vmatprep.mubr.f32.mxu1 %v3449_v12  ;;  %1479 = vmatprep.mubr.f32.mxu0 %v3449_v12  ;;  %1630 = vst [vmem:[%s2908_s21 + $0x210] sm:$0xff] %v637_v8  ;;  %1774 = vst [vmem:[%s2908_s21 + $0x690] sm:$0xff] %v781_v20  ;;  %v3471_v8 = vld [vmem:[#allocation37_spill] sm:$0xff] }
 0x184   : > { %v639_v27 = vpop.f32.mrf.mxu0  ;;  %v783_v18 = vpop.f32.mrf.mxu1 }
 0x185   : > { %1631 = vst [vmem:[%s2908_s21 + $0x218] sm:$0xff] %v639_v27  ;;  %1775 = vst [vmem:[%s2908_s21 + $0x698] sm:$0xff] %v783_v18  ;;  %v3472_v27 = vld [vmem:[#allocation38_spill] sm:$0xff] }
 0x186   : > { %1127 = vmatmul.mubr.f32.gmra.mxu1 %v3450_v22  ;;  %1480 = vmatmul.mubr.f32.gmra.mxu0 %v3450_v22  ;;  %v643_v31 = vpop.f32.mrf.mxu0  ;;  %v787_v28 = vpop.f32.mrf.mxu1 }
 0x187   : > { %1132 = vmatprep.mubr.f32.mxu1 %v3451_v30  ;;  %1485 = vmatprep.mubr.f32.mxu0 %v3451_v30  ;;  %1636 = vst [vmem:[%s2908_s21 + $0x240] sm:$0xff] %v643_v31  ;;  %1780 = vst [vmem:[%s2908_s21 + $0x6c0] sm:$0xff] %v787_v28  ;;  %v3473_v31 = vld [vmem:[#allocation39_spill] sm:$0xff] }
 0x188   : > { %v645_v36 = vpop.f32.mrf.mxu0  ;;  %v789_v40 = vpop.f32.mrf.mxu1 }
 0x189   : > { %1637 = vst [vmem:[%s2908_s21 + $0x248] sm:$0xff] %v645_v36  ;;  %1781 = vst [vmem:[%s2908_s21 + $0x6c8] sm:$0xff] %v789_v40  ;;  %v3474_v36 = vld [vmem:[#allocation40_spill] sm:$0xff] }
 0x18a   : > { %1133 = vmatmul.mubr.f32.gmra.mxu1 %v3452_v46  ;;  %1486 = vmatmul.mubr.f32.gmra.mxu0 %v3452_v46 }
 0x18b   : > { %1138 = vmatprep.mubr.f32.mxu1 %v3453_v50  ;;  %1491 = vmatprep.mubr.f32.mxu0 %v3453_v50  ;;  %v649_v56 = vpop.f32.mrf.mxu0  ;;  %v793_v58 = vpop.f32.mrf.mxu1 }
 0x18c   : > { %1642 = vst [vmem:[%s2908_s21 + $0x270] sm:$0xff] %v649_v56  ;;  %1786 = vst [vmem:[%s2908_s21 + $0x6f0] sm:$0xff] %v793_v58 }
 0x18d   : > { %v651_v1 = vpop.f32.mrf.mxu0  ;;  %v795_v6 = vpop.f32.mrf.mxu1 }
 0x18e   : > { %1139 = vmatmul.mubr.f32.gmra.mxu1 %v3454_v14  ;;  %1492 = vmatmul.mubr.f32.gmra.mxu0 %v3454_v14  ;;  %1643 = vst [vmem:[%s2908_s21 + $0x278] sm:$0xff] %v651_v1  ;;  %1787 = vst [vmem:[%s2908_s21 + $0x6f8] sm:$0xff] %v795_v6 }
 0x18f   : > { %1144 = vmatprep.mubr.f32.mxu1 %v3455_v19  ;;  %1497 = vmatprep.mubr.f32.mxu0 %v3455_v19 }
 0x190   : > { %v655_v26 = vpop.f32.mrf.mxu0  ;;  %v799_v29 = vpop.f32.mrf.mxu1 }
 0x191   : > { %1648 = vst [vmem:[%s2908_s21 + $0x2a0] sm:$0xff] %v655_v26  ;;  %1792 = vst [vmem:[%s2908_s21 + $0x720] sm:$0xff] %v799_v29 }
 0x192   : > { %1145 = vmatmul.mubr.f32.gmra.mxu1 %v3456_v37  ;;  %1498 = vmatmul.mubr.f32.gmra.mxu0 %v3456_v37  ;;  %v657_v38 = vpop.f32.mrf.mxu0  ;;  %v801_v42 = vpop.f32.mrf.mxu1 }
 0x193   : > { %1150 = vmatprep.mubr.f32.mxu1 %v3457_v43  ;;  %1503 = vmatprep.mubr.f32.mxu0 %v3457_v43  ;;  %1649 = vst [vmem:[%s2908_s21 + $0x2a8] sm:$0xff] %v657_v38  ;;  %1793 = vst [vmem:[%s2908_s21 + $0x728] sm:$0xff] %v801_v42 }
 0x194   : > { %v661_v49 = vpop.f32.mrf.mxu0  ;;  %v805_v51 = vpop.f32.mrf.mxu1 }
 0x195   : > { %1654 = vst [vmem:[%s2908_s21 + $0x2d0] sm:$0xff] %v661_v49  ;;  %1798 = vst [vmem:[%s2908_s21 + $0x750] sm:$0xff] %v805_v51 }
 0x196   : > { %1151 = vmatmul.mubr.f32.gmra.mxu1 %v3458_v54  ;;  %1504 = vmatmul.mubr.f32.gmra.mxu0 %v3458_v54  ;;  %v663_v55 = vpop.f32.mrf.mxu0  ;;  %v807_v62 = vpop.f32.mrf.mxu1 }
 0x197   : > { %1156 = vmatprep.mubr.f32.mxu1 %v3459_v63  ;;  %1509 = vmatprep.mubr.f32.mxu0 %v3459_v63  ;;  %1655 = vst [vmem:[%s2908_s21 + $0x2d8] sm:$0xff] %v663_v55  ;;  %1799 = vst [vmem:[%s2908_s21 + $0x758] sm:$0xff] %v807_v62 }
 0x199   : > { %v667_v3 = vpop.f32.mrf.mxu0  ;;  %v811_v4 = vpop.f32.mrf.mxu1 }
 0x19a   : > { %1157 = vmatmul.mubr.f32.gmra.mxu1 %v3460_v11  ;;  %1510 = vmatmul.mubr.f32.gmra.mxu0 %v3460_v11  ;;  %1660 = vst [vmem:[%s2908_s21 + $0x300] sm:$0xff] %v667_v3  ;;  %1804 = vst [vmem:[%s2908_s21 + $0x780] sm:$0xff] %v811_v4 }
 0x19b   : > { %1162 = vmatprep.mubr.f32.mxu1 %v3461_v21  ;;  %1515 = vmatprep.mubr.f32.mxu0 %v3461_v21  ;;  %v669_v23 = vpop.f32.mrf.mxu0  ;;  %v813_v34 = vpop.f32.mrf.mxu1 }
 0x19c   : > { %1661 = vst [vmem:[%s2908_s21 + $0x308] sm:$0xff] %v669_v23  ;;  %1805 = vst [vmem:[%s2908_s21 + $0x788] sm:$0xff] %v813_v34 }
 0x19e   : > { %1163 = vmatmul.mubr.f32.gmra.mxu1 %v3462_v44  ;;  %1516 = vmatmul.mubr.f32.gmra.mxu0 %v3462_v44  ;;  %v673_v57 = vpop.f32.mrf.mxu0  ;;  %v817_v60 = vpop.f32.mrf.mxu1 }
 0x19f   : > { %1168 = vmatprep.mubr.f32.mxu1 %v3463_v61  ;;  %1521 = vmatprep.mubr.f32.mxu0 %v3463_v61  ;;  %1666 = vst [vmem:[%s2908_s21 + $0x330] sm:$0xff] %v673_v57  ;;  %1810 = vst [vmem:[%s2908_s21 + $0x7b0] sm:$0xff] %v817_v60 }
 0x1a0   : > { %v675_v16 = vpop.f32.mrf.mxu0  ;;  %v819_v32 = vpop.f32.mrf.mxu1 }
 0x1a1   : > { %1667 = vst [vmem:[%s2908_s21 + $0x338] sm:$0xff] %v675_v16  ;;  %1811 = vst [vmem:[%s2908_s21 + $0x7b8] sm:$0xff] %v819_v32 }
 0x1a2   : > { %1169 = vmatmul.mubr.f32.gmra.mxu1 %v3464_v33  ;;  %1522 = vmatmul.mubr.f32.gmra.mxu0 %v3464_v33  ;;  %v679_v52 = vpop.f32.mrf.mxu0  ;;  %v823_v9 = vpop.f32.mrf.mxu1 }
 0x1a3   : > { %1174 = vmatprep.mubr.f32.mxu1 %v3465_v47  ;;  %1527 = vmatprep.mubr.f32.mxu0 %v3465_v47  ;;  %1672 = vst [vmem:[%s2908_s21 + $0x360] sm:$0xff] %v679_v52  ;;  %1816 = vst [vmem:[%s2908_s21 + $0x7e0] sm:$0xff] %v823_v9 }
 0x1a4   : > { %v681_v24 = vpop.f32.mrf.mxu0  ;;  %v825_v17 = vpop.f32.mrf.mxu1 }
 0x1a5   : > { %1673 = vst [vmem:[%s2908_s21 + $0x368] sm:$0xff] %v681_v24  ;;  %1817 = vst [vmem:[%s2908_s21 + $0x7e8] sm:$0xff] %v825_v17 }
 0x1a6   : > { %1175 = vmatmul.mubr.f32.gmra.mxu1 %v3466_v10  ;;  %1528 = vmatmul.mubr.f32.gmra.mxu0 %v3466_v10 }
 0x1a7   : > { %1180 = vmatprep.mubr.f32.mxu1 %v3467_v39  ;;  %1533 = vmatprep.mubr.f32.mxu0 %v3467_v39  ;;  %v685_v5 = vpop.f32.mrf.mxu0  ;;  %v829_v7 = vpop.f32.mrf.mxu1 }
 0x1a8   : > { %1678 = vst [vmem:[%s2908_s21 + $0x390] sm:$0xff] %v685_v5  ;;  %1822 = vst [vmem:[%s2908_s21 + $0x810] sm:$0xff] %v829_v7 }
 0x1a9   : > { %v687_v35 = vpop.f32.mrf.mxu0  ;;  %v831_v48 = vpop.f32.mrf.mxu1 }
 0x1aa   : > { %1181 = vmatmul.mubr.f32.gmra.mxu1 %v3468_v45  ;;  %1534 = vmatmul.mubr.f32.gmra.mxu0 %v3468_v45  ;;  %1679 = vst [vmem:[%s2908_s21 + $0x398] sm:$0xff] %v687_v35  ;;  %1823 = vst [vmem:[%s2908_s21 + $0x818] sm:$0xff] %v831_v48 }
 0x1ab   : > { %1186 = vmatprep.mubr.f32.mxu1 %v3469_v25  ;;  %1539 = vmatprep.mubr.f32.mxu0 %v3469_v25 }
 0x1ac   : > { %v691_v13 = vpop.f32.mrf.mxu0  ;;  %v835_v53 = vpop.f32.mrf.mxu1 }
 0x1ad   : > { %1684 = vst [vmem:[%s2908_s21 + $0x3c0] sm:$0xff] %v691_v13  ;;  %1828 = vst [vmem:[%s2908_s21 + $0x840] sm:$0xff] %v835_v53 }
 0x1ae   : > { %1187 = vmatmul.mubr.f32.gmra.mxu1 %v3470_v0  ;;  %1540 = vmatmul.mubr.f32.gmra.mxu0 %v3470_v0  ;;  %v693_v15 = vpop.f32.mrf.mxu0  ;;  %v837_v2 = vpop.f32.mrf.mxu1 }
 0x1af   : > { %1685 = vst [vmem:[%s2908_s21 + $0x3c8] sm:$0xff] %v693_v15  ;;  %1829 = vst [vmem:[%s2908_s21 + $0x848] sm:$0xff] %v837_v2  ;;  %1192 = vmatprep.mubr.f32.mxu1 %v3471_v8  ;;  %1545 = vmatprep.mubr.f32.mxu0 %v3471_v8 }
 0x1b0   : > { %v697_v20 = vpop.f32.mrf.mxu0  ;;  %v841_v12 = vpop.f32.mrf.mxu1 }
 0x1b1   : > { %1690 = vst [vmem:[%s2908_s21 + $0x3f0] sm:$0xff] %v697_v20  ;;  %1834 = vst [vmem:[%s2908_s21 + $0x870] sm:$0xff] %v841_v12 }
 0x1b2   : > { %1193 = vmatmul.mubr.f32.gmra.mxu1 %v3472_v27  ;;  %1546 = vmatmul.mubr.f32.gmra.mxu0 %v3472_v27  ;;  %v699_v18 = vpop.f32.mrf.mxu0  ;;  %v843_v22 = vpop.f32.mrf.mxu1 }
 0x1b3   : > { %1691 = vst [vmem:[%s2908_s21 + $0x3f8] sm:$0xff] %v699_v18  ;;  %1835 = vst [vmem:[%s2908_s21 + $0x878] sm:$0xff] %v843_v22  ;;  %1198 = vmatprep.mubr.f32.mxu1 %v3473_v31  ;;  %1551 = vmatprep.mubr.f32.mxu0 %v3473_v31 }
 0x1b5   : > { %v703_v28 = vpop.f32.mrf.mxu0  ;;  %v847_v30 = vpop.f32.mrf.mxu1 }
 0x1b6   : > { %1696 = vst [vmem:[%s2908_s21 + $0x420] sm:$0xff] %v703_v28  ;;  %1840 = vst [vmem:[%s2908_s21 + $0x8a0] sm:$0xff] %v847_v30  ;;  %1199 = vmatmul.mubr.f32.gmra.mxu1 %v3474_v36  ;;  %1552 = vmatmul.mubr.f32.gmra.mxu0 %v3474_v36 }
 0x1b7   : > { %v705_v40 = vpop.f32.mrf.mxu0  ;;  %v849_v46 = vpop.f32.mrf.mxu1  ;;  %1204 = vmatprep.mubr.f32.mxu1 %v2809_v41  ;;  %1557 = vmatprep.mubr.f32.mxu0 %v2809_v41 }
 0x1b8   : > { %1697 = vst [vmem:[%s2908_s21 + $0x428] sm:$0xff] %v705_v40  ;;  %1841 = vst [vmem:[%s2908_s21 + $0x8a8] sm:$0xff] %v849_v46 }
 0x1ba   : > { %v709_v50 = vpop.f32.mrf.mxu0  ;;  %v853_v56 = vpop.f32.mrf.mxu1  ;;  %1205 = vmatmul.mubr.f32.gmra.mxu1 %v2815_v59  ;;  %1558 = vmatmul.mubr.f32.gmra.mxu0 %v2815_v59 }
 0x1bb   : > { %1702 = vst [vmem:[%s2908_s21 + $0x450] sm:$0xff] %v709_v50  ;;  %1846 = vst [vmem:[%s2908_s21 + $0x8d0] sm:$0xff] %v853_v56 }
 0x1bc   : > { %v711_v58 = vpop.f32.mrf.mxu0  ;;  %v855_v1 = vpop.f32.mrf.mxu1 }
 0x1bd   : > { %1703 = vst [vmem:[%s2908_s21 + $0x458] sm:$0xff] %v711_v58  ;;  %1847 = vst [vmem:[%s2908_s21 + $0x8d8] sm:$0xff] %v855_v1 }
 0x1be   : > { %v924_v41 = vpop.f32.mrf.mxu1  ;;  %v1277_v6 = vpop.f32.mrf.mxu0 }
 0x1bf   : > { %1566 = vst [vmem:[%s2908_s21 + $0x10] sm:$0xff] %v924_v41  ;;  %1568 = vst [vmem:[%s2908_s21 + $0x20] sm:$0xff] %v1277_v6 }
 0x1c0   : > { %v926_v14 = vpop.f32.mrf.mxu1  ;;  %v1279_v19 = vpop.f32.mrf.mxu0 }
 0x1c1   : > { %1567 = vst [vmem:[%s2908_s21 + $0x18] sm:$0xff] %v926_v14  ;;  %1569 = vst [vmem:[%s2908_s21 + $0x28] sm:$0xff] %v1279_v19 }
 0x1c2   : > { %v930_v59 = vpop.f32.mrf.mxu1  ;;  %v1283_v26 = vpop.f32.mrf.mxu0 }
 0x1c3   : > { %1572 = vst [vmem:[%s2908_s21 + $0x40] sm:$0xff] %v930_v59  ;;  %1574 = vst [vmem:[%s2908_s21 + $0x50] sm:$0xff] %v1283_v26 }
 0x1c4   : > { %v932_v29 = vpop.f32.mrf.mxu1  ;;  %v1285_v37 = vpop.f32.mrf.mxu0 }
 0x1c5   : > { %1573 = vst [vmem:[%s2908_s21 + $0x48] sm:$0xff] %v932_v29  ;;  %1575 = vst [vmem:[%s2908_s21 + $0x58] sm:$0xff] %v1285_v37 }
 0x1c6   : > { %v936_v38 = vpop.f32.mrf.mxu1  ;;  %v1289_v42 = vpop.f32.mrf.mxu0 }
 0x1c7   : > { %1578 = vst [vmem:[%s2908_s21 + $0x70] sm:$0xff] %v936_v38  ;;  %1580 = vst [vmem:[%s2908_s21 + $0x80] sm:$0xff] %v1289_v42 }
 0x1c8   : > { %v938_v43 = vpop.f32.mrf.mxu1  ;;  %v1291_v49 = vpop.f32.mrf.mxu0 }
 0x1c9   : > { %1579 = vst [vmem:[%s2908_s21 + $0x78] sm:$0xff] %v938_v43  ;;  %1581 = vst [vmem:[%s2908_s21 + $0x88] sm:$0xff] %v1291_v49 }
 0x1ca   : > { %v942_v51 = vpop.f32.mrf.mxu1  ;;  %v1295_v54 = vpop.f32.mrf.mxu0 }
 0x1cb   : > { %1584 = vst [vmem:[%s2908_s21 + $0xa0] sm:$0xff] %v942_v51  ;;  %1586 = vst [vmem:[%s2908_s21 + $0xb0] sm:$0xff] %v1295_v54 }
 0x1cc   : > { %v944_v55 = vpop.f32.mrf.mxu1  ;;  %v1297_v62 = vpop.f32.mrf.mxu0 }
 0x1cd   : > { %1585 = vst [vmem:[%s2908_s21 + $0xa8] sm:$0xff] %v944_v55  ;;  %1587 = vst [vmem:[%s2908_s21 + $0xb8] sm:$0xff] %v1297_v62 }
 0x1ce   : > { %v948_v63 = vpop.f32.mrf.mxu1  ;;  %v1301_v3 = vpop.f32.mrf.mxu0 }
 0x1cf   : > { %1590 = vst [vmem:[%s2908_s21 + $0xd0] sm:$0xff] %v948_v63  ;;  %1592 = vst [vmem:[%s2908_s21 + $0xe0] sm:$0xff] %v1301_v3 }
 0x1d0   : > { %v950_v4 = vpop.f32.mrf.mxu1  ;;  %v1303_v11 = vpop.f32.mrf.mxu0 }
 0x1d1   : > { %1591 = vst [vmem:[%s2908_s21 + $0xd8] sm:$0xff] %v950_v4  ;;  %1593 = vst [vmem:[%s2908_s21 + $0xe8] sm:$0xff] %v1303_v11 }
 0x1d2   : > { %v954_v21 = vpop.f32.mrf.mxu1  ;;  %v1307_v23 = vpop.f32.mrf.mxu0 }
 0x1d3   : > { %1596 = vst [vmem:[%s2908_s21 + $0x100] sm:$0xff] %v954_v21  ;;  %1598 = vst [vmem:[%s2908_s21 + $0x110] sm:$0xff] %v1307_v23 }
 0x1d4   : > { %v956_v34 = vpop.f32.mrf.mxu1  ;;  %v1309_v44 = vpop.f32.mrf.mxu0 }
 0x1d5   : > { %1597 = vst [vmem:[%s2908_s21 + $0x108] sm:$0xff] %v956_v34  ;;  %1599 = vst [vmem:[%s2908_s21 + $0x118] sm:$0xff] %v1309_v44 }
 0x1d6   : > { %v960_v57 = vpop.f32.mrf.mxu1  ;;  %v1313_v60 = vpop.f32.mrf.mxu0 }
 0x1d7   : > { %1602 = vst [vmem:[%s2908_s21 + $0x130] sm:$0xff] %v960_v57  ;;  %1604 = vst [vmem:[%s2908_s21 + $0x140] sm:$0xff] %v1313_v60 }
 0x1d8   : > { %v962_v61 = vpop.f32.mrf.mxu1  ;;  %v1315_v16 = vpop.f32.mrf.mxu0 }
 0x1d9   : > { %1603 = vst [vmem:[%s2908_s21 + $0x138] sm:$0xff] %v962_v61  ;;  %1605 = vst [vmem:[%s2908_s21 + $0x148] sm:$0xff] %v1315_v16 }
 0x1da   : > { %v966_v32 = vpop.f32.mrf.mxu1  ;;  %v1319_v33 = vpop.f32.mrf.mxu0 }
 0x1db   : > { %1608 = vst [vmem:[%s2908_s21 + $0x160] sm:$0xff] %v966_v32  ;;  %1610 = vst [vmem:[%s2908_s21 + $0x170] sm:$0xff] %v1319_v33 }
 0x1dc   : > { %v968_v52 = vpop.f32.mrf.mxu1  ;;  %v1321_v9 = vpop.f32.mrf.mxu0 }
 0x1dd   : > { %1609 = vst [vmem:[%s2908_s21 + $0x168] sm:$0xff] %v968_v52  ;;  %1611 = vst [vmem:[%s2908_s21 + $0x178] sm:$0xff] %v1321_v9 }
 0x1de   : > { %v972_v47 = vpop.f32.mrf.mxu1  ;;  %v1325_v24 = vpop.f32.mrf.mxu0 }
 0x1df   : > { %1614 = vst [vmem:[%s2908_s21 + $0x190] sm:$0xff] %v972_v47  ;;  %1616 = vst [vmem:[%s2908_s21 + $0x1a0] sm:$0xff] %v1325_v24 }
 0x1e0   : > { %v974_v17 = vpop.f32.mrf.mxu1  ;;  %v1327_v10 = vpop.f32.mrf.mxu0 }
 0x1e1   : > { %1615 = vst [vmem:[%s2908_s21 + $0x198] sm:$0xff] %v974_v17  ;;  %1617 = vst [vmem:[%s2908_s21 + $0x1a8] sm:$0xff] %v1327_v10 }
 0x1e2   : > { %v978_v39 = vpop.f32.mrf.mxu1  ;;  %v1331_v5 = vpop.f32.mrf.mxu0 }
 0x1e3   : > { %1620 = vst [vmem:[%s2908_s21 + $0x1c0] sm:$0xff] %v978_v39  ;;  %1622 = vst [vmem:[%s2908_s21 + $0x1d0] sm:$0xff] %v1331_v5 }
 0x1e4   : > { %v980_v7 = vpop.f32.mrf.mxu1  ;;  %v1333_v35 = vpop.f32.mrf.mxu0 }
 0x1e5   : > { %1621 = vst [vmem:[%s2908_s21 + $0x1c8] sm:$0xff] %v980_v7  ;;  %1623 = vst [vmem:[%s2908_s21 + $0x1d8] sm:$0xff] %v1333_v35 }
 0x1e6   : > { %v984_v48 = vpop.f32.mrf.mxu1  ;;  %v1337_v45 = vpop.f32.mrf.mxu0 }
 0x1e7   : > { %1626 = vst [vmem:[%s2908_s21 + $0x1f0] sm:$0xff] %v984_v48  ;;  %1628 = vst [vmem:[%s2908_s21 + $0x200] sm:$0xff] %v1337_v45 }
 0x1e8   : > { %v986_v25 = vpop.f32.mrf.mxu1  ;;  %v1339_v13 = vpop.f32.mrf.mxu0 }
 0x1e9   : > { %1627 = vst [vmem:[%s2908_s21 + $0x1f8] sm:$0xff] %v986_v25  ;;  %1629 = vst [vmem:[%s2908_s21 + $0x208] sm:$0xff] %v1339_v13 }
 0x1ea   : > { %v990_v53 = vpop.f32.mrf.mxu1  ;;  %v1343_v0 = vpop.f32.mrf.mxu0 }
 0x1eb   : > { %1632 = vst [vmem:[%s2908_s21 + $0x220] sm:$0xff] %v990_v53  ;;  %1634 = vst [vmem:[%s2908_s21 + $0x230] sm:$0xff] %v1343_v0 }
 0x1ec   : > { %v992_v15 = vpop.f32.mrf.mxu1  ;;  %v1345_v2 = vpop.f32.mrf.mxu0 }
 0x1ed   : > { %1633 = vst [vmem:[%s2908_s21 + $0x228] sm:$0xff] %v992_v15  ;;  %1635 = vst [vmem:[%s2908_s21 + $0x238] sm:$0xff] %v1345_v2 }
 0x1ee   : > { %v996_v8 = vpop.f32.mrf.mxu1  ;;  %v1349_v20 = vpop.f32.mrf.mxu0 }
 0x1ef   : > { %1638 = vst [vmem:[%s2908_s21 + $0x250] sm:$0xff] %v996_v8  ;;  %1640 = vst [vmem:[%s2908_s21 + $0x260] sm:$0xff] %v1349_v20 }
 0x1f0   : > { %v998_v12 = vpop.f32.mrf.mxu1  ;;  %v1351_v27 = vpop.f32.mrf.mxu0 }
 0x1f1   : > { %1639 = vst [vmem:[%s2908_s21 + $0x258] sm:$0xff] %v998_v12  ;;  %1641 = vst [vmem:[%s2908_s21 + $0x268] sm:$0xff] %v1351_v27 }
 0x1f2   : > { %v1002_v18 = vpop.f32.mrf.mxu1  ;;  %v1355_v22 = vpop.f32.mrf.mxu0 }
 0x1f3   : > { %1644 = vst [vmem:[%s2908_s21 + $0x280] sm:$0xff] %v1002_v18  ;;  %1646 = vst [vmem:[%s2908_s21 + $0x290] sm:$0xff] %v1355_v22 }
 0x1f4   : > { %v1004_v31 = vpop.f32.mrf.mxu1  ;;  %v1357_v28 = vpop.f32.mrf.mxu0 }
 0x1f5   : > { %1645 = vst [vmem:[%s2908_s21 + $0x288] sm:$0xff] %v1004_v31  ;;  %1647 = vst [vmem:[%s2908_s21 + $0x298] sm:$0xff] %v1357_v28 }
 0x1f6   : > { %v1008_v30 = vpop.f32.mrf.mxu1  ;;  %v1361_v36 = vpop.f32.mrf.mxu0 }
 0x1f7   : > { %1650 = vst [vmem:[%s2908_s21 + $0x2b0] sm:$0xff] %v1008_v30  ;;  %1652 = vst [vmem:[%s2908_s21 + $0x2c0] sm:$0xff] %v1361_v36 }
 0x1f8   : > { %v1010_v40 = vpop.f32.mrf.mxu1  ;;  %v1363_v46 = vpop.f32.mrf.mxu0 }
 0x1f9   : > { %1651 = vst [vmem:[%s2908_s21 + $0x2b8] sm:$0xff] %v1010_v40  ;;  %1653 = vst [vmem:[%s2908_s21 + $0x2c8] sm:$0xff] %v1363_v46 }
 0x1fa   : > { %v1014_v50 = vpop.f32.mrf.mxu1  ;;  %v1367_v56 = vpop.f32.mrf.mxu0 }
 0x1fb   : > { %1656 = vst [vmem:[%s2908_s21 + $0x2e0] sm:$0xff] %v1014_v50  ;;  %1658 = vst [vmem:[%s2908_s21 + $0x2f0] sm:$0xff] %v1367_v56 }
 0x1fc   : > { %v1016_v58 = vpop.f32.mrf.mxu1  ;;  %v1369_v1 = vpop.f32.mrf.mxu0 }
 0x1fd   : > { %1657 = vst [vmem:[%s2908_s21 + $0x2e8] sm:$0xff] %v1016_v58  ;;  %1659 = vst [vmem:[%s2908_s21 + $0x2f8] sm:$0xff] %v1369_v1 }
 0x1fe   : > { %v1020_v41 = vpop.f32.mrf.mxu1  ;;  %v1373_v6 = vpop.f32.mrf.mxu0 }
 0x1ff   : > { %1662 = vst [vmem:[%s2908_s21 + $0x310] sm:$0xff] %v1020_v41  ;;  %1664 = vst [vmem:[%s2908_s21 + $0x320] sm:$0xff] %v1373_v6 }
 0x200   : > { %v1022_v14 = vpop.f32.mrf.mxu1  ;;  %v1375_v19 = vpop.f32.mrf.mxu0 }
 0x201   : > { %1663 = vst [vmem:[%s2908_s21 + $0x318] sm:$0xff] %v1022_v14  ;;  %1665 = vst [vmem:[%s2908_s21 + $0x328] sm:$0xff] %v1375_v19 }
 0x202   : > { %v1026_v59 = vpop.f32.mrf.mxu1  ;;  %v1379_v26 = vpop.f32.mrf.mxu0 }
 0x203   : > { %1668 = vst [vmem:[%s2908_s21 + $0x340] sm:$0xff] %v1026_v59  ;;  %1670 = vst [vmem:[%s2908_s21 + $0x350] sm:$0xff] %v1379_v26 }
 0x204   : > { %v1028_v29 = vpop.f32.mrf.mxu1  ;;  %v1381_v37 = vpop.f32.mrf.mxu0 }
 0x205   : > { %1669 = vst [vmem:[%s2908_s21 + $0x348] sm:$0xff] %v1028_v29  ;;  %1671 = vst [vmem:[%s2908_s21 + $0x358] sm:$0xff] %v1381_v37 }
 0x206   : > { %v1032_v38 = vpop.f32.mrf.mxu1  ;;  %v1385_v42 = vpop.f32.mrf.mxu0 }
 0x207   : > { %1674 = vst [vmem:[%s2908_s21 + $0x370] sm:$0xff] %v1032_v38  ;;  %1676 = vst [vmem:[%s2908_s21 + $0x380] sm:$0xff] %v1385_v42 }
 0x208   : > { %v1034_v43 = vpop.f32.mrf.mxu1  ;;  %v1387_v49 = vpop.f32.mrf.mxu0 }
 0x209   : > { %1675 = vst [vmem:[%s2908_s21 + $0x378] sm:$0xff] %v1034_v43  ;;  %1677 = vst [vmem:[%s2908_s21 + $0x388] sm:$0xff] %v1387_v49 }
 0x20a   : > { %v1038_v51 = vpop.f32.mrf.mxu1  ;;  %v1391_v54 = vpop.f32.mrf.mxu0 }
 0x20b   : > { %1680 = vst [vmem:[%s2908_s21 + $0x3a0] sm:$0xff] %v1038_v51  ;;  %1682 = vst [vmem:[%s2908_s21 + $0x3b0] sm:$0xff] %v1391_v54 }
 0x20c   : > { %v1040_v55 = vpop.f32.mrf.mxu1  ;;  %v1393_v62 = vpop.f32.mrf.mxu0 }
 0x20d   : > { %1681 = vst [vmem:[%s2908_s21 + $0x3a8] sm:$0xff] %v1040_v55  ;;  %1683 = vst [vmem:[%s2908_s21 + $0x3b8] sm:$0xff] %v1393_v62 }
 0x20e   : > { %v1044_v63 = vpop.f32.mrf.mxu1  ;;  %v1397_v3 = vpop.f32.mrf.mxu0 }
 0x20f   : > { %1686 = vst [vmem:[%s2908_s21 + $0x3d0] sm:$0xff] %v1044_v63  ;;  %1688 = vst [vmem:[%s2908_s21 + $0x3e0] sm:$0xff] %v1397_v3 }
 0x210   : > { %v1046_v4 = vpop.f32.mrf.mxu1  ;;  %v1399_v11 = vpop.f32.mrf.mxu0 }
 0x211   : > { %1687 = vst [vmem:[%s2908_s21 + $0x3d8] sm:$0xff] %v1046_v4  ;;  %1689 = vst [vmem:[%s2908_s21 + $0x3e8] sm:$0xff] %v1399_v11 }
 0x212   : > { %v1050_v21 = vpop.f32.mrf.mxu1  ;;  %v1403_v23 = vpop.f32.mrf.mxu0 }
 0x213   : > { %1692 = vst [vmem:[%s2908_s21 + $0x400] sm:$0xff] %v1050_v21  ;;  %1694 = vst [vmem:[%s2908_s21 + $0x410] sm:$0xff] %v1403_v23 }
 0x214   : > { %v1052_v34 = vpop.f32.mrf.mxu1  ;;  %v1405_v44 = vpop.f32.mrf.mxu0 }
 0x215   : > { %1693 = vst [vmem:[%s2908_s21 + $0x408] sm:$0xff] %v1052_v34  ;;  %1695 = vst [vmem:[%s2908_s21 + $0x418] sm:$0xff] %v1405_v44 }
 0x216   : > { %v1056_v57 = vpop.f32.mrf.mxu1  ;;  %v1409_v60 = vpop.f32.mrf.mxu0 }
 0x217   : > { %1698 = vst [vmem:[%s2908_s21 + $0x430] sm:$0xff] %v1056_v57  ;;  %1700 = vst [vmem:[%s2908_s21 + $0x440] sm:$0xff] %v1409_v60 }
 0x218   : > { %v1058_v61 = vpop.f32.mrf.mxu1  ;;  %v1411_v16 = vpop.f32.mrf.mxu0 }
 0x219   : > { %1699 = vst [vmem:[%s2908_s21 + $0x438] sm:$0xff] %v1058_v61  ;;  %1701 = vst [vmem:[%s2908_s21 + $0x448] sm:$0xff] %v1411_v16 }
 0x21a   : > { %v1062_v32 = vpop.f32.mrf.mxu1  ;;  %v1415_v33 = vpop.f32.mrf.mxu0 }
 0x21b   : > { %1704 = vst [vmem:[%s2908_s21 + $0x460] sm:$0xff] %v1062_v32  ;;  %1706 = vst [vmem:[%s2908_s21 + $0x470] sm:$0xff] %v1415_v33 }
 0x21c   : > { %v1064_v52 = vpop.f32.mrf.mxu1  ;;  %v1417_v9 = vpop.f32.mrf.mxu0 }
 0x21d   : > { %1705 = vst [vmem:[%s2908_s21 + $0x468] sm:$0xff] %v1064_v52  ;;  %1707 = vst [vmem:[%s2908_s21 + $0x478] sm:$0xff] %v1417_v9 }
 0x21e   : > { %v1068_v47 = vpop.f32.mrf.mxu1  ;;  %v1421_v24 = vpop.f32.mrf.mxu0 }
 0x21f   : > { %1710 = vst [vmem:[%s2908_s21 + $0x490] sm:$0xff] %v1068_v47  ;;  %1712 = vst [vmem:[%s2908_s21 + $0x4a0] sm:$0xff] %v1421_v24 }
 0x220   : > { %v1070_v17 = vpop.f32.mrf.mxu1  ;;  %v1423_v10 = vpop.f32.mrf.mxu0 }
 0x221   : > { %1711 = vst [vmem:[%s2908_s21 + $0x498] sm:$0xff] %v1070_v17  ;;  %1713 = vst [vmem:[%s2908_s21 + $0x4a8] sm:$0xff] %v1423_v10 }
 0x222   : > { %v1074_v39 = vpop.f32.mrf.mxu1  ;;  %v1427_v5 = vpop.f32.mrf.mxu0 }
 0x223   : > { %1716 = vst [vmem:[%s2908_s21 + $0x4c0] sm:$0xff] %v1074_v39  ;;  %1718 = vst [vmem:[%s2908_s21 + $0x4d0] sm:$0xff] %v1427_v5 }
 0x224   : > { %v1076_v7 = vpop.f32.mrf.mxu1  ;;  %v1429_v35 = vpop.f32.mrf.mxu0 }
 0x225   : > { %1717 = vst [vmem:[%s2908_s21 + $0x4c8] sm:$0xff] %v1076_v7  ;;  %1719 = vst [vmem:[%s2908_s21 + $0x4d8] sm:$0xff] %v1429_v35 }
 0x226   : > { %v1080_v48 = vpop.f32.mrf.mxu1  ;;  %v1433_v45 = vpop.f32.mrf.mxu0 }
 0x227   : > { %1722 = vst [vmem:[%s2908_s21 + $0x4f0] sm:$0xff] %v1080_v48  ;;  %1724 = vst [vmem:[%s2908_s21 + $0x500] sm:$0xff] %v1433_v45 }
 0x228   : > { %v1082_v25 = vpop.f32.mrf.mxu1  ;;  %v1435_v13 = vpop.f32.mrf.mxu0 }
 0x229   : > { %1723 = vst [vmem:[%s2908_s21 + $0x4f8] sm:$0xff] %v1082_v25  ;;  %1725 = vst [vmem:[%s2908_s21 + $0x508] sm:$0xff] %v1435_v13 }
 0x22a   : > { %v1086_v53 = vpop.f32.mrf.mxu1  ;;  %v1439_v0 = vpop.f32.mrf.mxu0 }
 0x22b   : > { %1728 = vst [vmem:[%s2908_s21 + $0x520] sm:$0xff] %v1086_v53  ;;  %1730 = vst [vmem:[%s2908_s21 + $0x530] sm:$0xff] %v1439_v0 }
 0x22c   : > { %v1088_v15 = vpop.f32.mrf.mxu1  ;;  %v1441_v2 = vpop.f32.mrf.mxu0 }
 0x22d   : > { %1729 = vst [vmem:[%s2908_s21 + $0x528] sm:$0xff] %v1088_v15  ;;  %1731 = vst [vmem:[%s2908_s21 + $0x538] sm:$0xff] %v1441_v2 }
 0x22e   : > { %v1092_v8 = vpop.f32.mrf.mxu1  ;;  %v1445_v20 = vpop.f32.mrf.mxu0 }
 0x22f   : > { %1734 = vst [vmem:[%s2908_s21 + $0x550] sm:$0xff] %v1092_v8  ;;  %1736 = vst [vmem:[%s2908_s21 + $0x560] sm:$0xff] %v1445_v20 }
 0x230   : > { %v1094_v12 = vpop.f32.mrf.mxu1  ;;  %v1447_v27 = vpop.f32.mrf.mxu0 }
 0x231   : > { %1735 = vst [vmem:[%s2908_s21 + $0x558] sm:$0xff] %v1094_v12  ;;  %1737 = vst [vmem:[%s2908_s21 + $0x568] sm:$0xff] %v1447_v27 }
 0x232   : > { %v1098_v18 = vpop.f32.mrf.mxu1  ;;  %v1451_v22 = vpop.f32.mrf.mxu0 }
 0x233   : > { %1740 = vst [vmem:[%s2908_s21 + $0x580] sm:$0xff] %v1098_v18  ;;  %1742 = vst [vmem:[%s2908_s21 + $0x590] sm:$0xff] %v1451_v22 }
 0x234   : > { %v1100_v31 = vpop.f32.mrf.mxu1  ;;  %v1453_v28 = vpop.f32.mrf.mxu0 }
 0x235   : > { %1741 = vst [vmem:[%s2908_s21 + $0x588] sm:$0xff] %v1100_v31  ;;  %1743 = vst [vmem:[%s2908_s21 + $0x598] sm:$0xff] %v1453_v28 }
 0x236   : > { %v1104_v30 = vpop.f32.mrf.mxu1  ;;  %v1457_v36 = vpop.f32.mrf.mxu0 }
 0x237   : > { %1746 = vst [vmem:[%s2908_s21 + $0x5b0] sm:$0xff] %v1104_v30  ;;  %1748 = vst [vmem:[%s2908_s21 + $0x5c0] sm:$0xff] %v1457_v36 }
 0x238   : > { %v1106_v40 = vpop.f32.mrf.mxu1  ;;  %v1459_v46 = vpop.f32.mrf.mxu0 }
 0x239   : > { %1747 = vst [vmem:[%s2908_s21 + $0x5b8] sm:$0xff] %v1106_v40  ;;  %1749 = vst [vmem:[%s2908_s21 + $0x5c8] sm:$0xff] %v1459_v46 }
 0x23a   : > { %v1110_v50 = vpop.f32.mrf.mxu1  ;;  %v1463_v56 = vpop.f32.mrf.mxu0 }
 0x23b   : > { %1752 = vst [vmem:[%s2908_s21 + $0x5e0] sm:$0xff] %v1110_v50  ;;  %1754 = vst [vmem:[%s2908_s21 + $0x5f0] sm:$0xff] %v1463_v56 }
 0x23c   : > { %v1112_v58 = vpop.f32.mrf.mxu1  ;;  %v1465_v1 = vpop.f32.mrf.mxu0 }
 0x23d   : > { %1753 = vst [vmem:[%s2908_s21 + $0x5e8] sm:$0xff] %v1112_v58  ;;  %1755 = vst [vmem:[%s2908_s21 + $0x5f8] sm:$0xff] %v1465_v1 }
 0x23e   : > { %v1116_v41 = vpop.f32.mrf.mxu1  ;;  %v1469_v6 = vpop.f32.mrf.mxu0 }
 0x23f   : > { %1758 = vst [vmem:[%s2908_s21 + $0x610] sm:$0xff] %v1116_v41  ;;  %1760 = vst [vmem:[%s2908_s21 + $0x620] sm:$0xff] %v1469_v6 }
 0x240   : > { %v1118_v14 = vpop.f32.mrf.mxu1  ;;  %v1471_v19 = vpop.f32.mrf.mxu0 }
 0x241   : > { %1759 = vst [vmem:[%s2908_s21 + $0x618] sm:$0xff] %v1118_v14  ;;  %1761 = vst [vmem:[%s2908_s21 + $0x628] sm:$0xff] %v1471_v19 }
 0x242   : > { %v1122_v59 = vpop.f32.mrf.mxu1  ;;  %v1475_v26 = vpop.f32.mrf.mxu0 }
 0x243   : > { %1764 = vst [vmem:[%s2908_s21 + $0x640] sm:$0xff] %v1122_v59  ;;  %1766 = vst [vmem:[%s2908_s21 + $0x650] sm:$0xff] %v1475_v26 }
 0x244   : > { %v1124_v29 = vpop.f32.mrf.mxu1  ;;  %v1477_v37 = vpop.f32.mrf.mxu0 }
 0x245   : > { %1765 = vst [vmem:[%s2908_s21 + $0x648] sm:$0xff] %v1124_v29  ;;  %1767 = vst [vmem:[%s2908_s21 + $0x658] sm:$0xff] %v1477_v37 }
 0x246   : > { %v1128_v38 = vpop.f32.mrf.mxu1  ;;  %v1481_v42 = vpop.f32.mrf.mxu0 }
 0x247   : > { %1770 = vst [vmem:[%s2908_s21 + $0x670] sm:$0xff] %v1128_v38  ;;  %1772 = vst [vmem:[%s2908_s21 + $0x680] sm:$0xff] %v1481_v42 }
 0x248   : > { %v1130_v43 = vpop.f32.mrf.mxu1  ;;  %v1483_v49 = vpop.f32.mrf.mxu0 }
 0x249   : > { %1771 = vst [vmem:[%s2908_s21 + $0x678] sm:$0xff] %v1130_v43  ;;  %1773 = vst [vmem:[%s2908_s21 + $0x688] sm:$0xff] %v1483_v49 }
 0x24a   : > { %v1134_v51 = vpop.f32.mrf.mxu1  ;;  %v1487_v54 = vpop.f32.mrf.mxu0 }
 0x24b   : > { %1776 = vst [vmem:[%s2908_s21 + $0x6a0] sm:$0xff] %v1134_v51  ;;  %1778 = vst [vmem:[%s2908_s21 + $0x6b0] sm:$0xff] %v1487_v54 }
 0x24c   : > { %v1136_v55 = vpop.f32.mrf.mxu1  ;;  %v1489_v62 = vpop.f32.mrf.mxu0 }
 0x24d   : > { %1777 = vst [vmem:[%s2908_s21 + $0x6a8] sm:$0xff] %v1136_v55  ;;  %1779 = vst [vmem:[%s2908_s21 + $0x6b8] sm:$0xff] %v1489_v62 }
 0x24e   : > { %v1140_v63 = vpop.f32.mrf.mxu1  ;;  %v1493_v3 = vpop.f32.mrf.mxu0 }
 0x24f   : > { %1782 = vst [vmem:[%s2908_s21 + $0x6d0] sm:$0xff] %v1140_v63  ;;  %1784 = vst [vmem:[%s2908_s21 + $0x6e0] sm:$0xff] %v1493_v3 }
 0x250   : > { %v1142_v4 = vpop.f32.mrf.mxu1  ;;  %v1495_v11 = vpop.f32.mrf.mxu0 }
 0x251   : > { %1783 = vst [vmem:[%s2908_s21 + $0x6d8] sm:$0xff] %v1142_v4  ;;  %1785 = vst [vmem:[%s2908_s21 + $0x6e8] sm:$0xff] %v1495_v11 }
 0x252   : > { %v1146_v21 = vpop.f32.mrf.mxu1  ;;  %v1499_v23 = vpop.f32.mrf.mxu0 }
 0x253   : > { %1788 = vst [vmem:[%s2908_s21 + $0x700] sm:$0xff] %v1146_v21  ;;  %1790 = vst [vmem:[%s2908_s21 + $0x710] sm:$0xff] %v1499_v23 }
 0x254   : > { %v1148_v34 = vpop.f32.mrf.mxu1  ;;  %v1501_v44 = vpop.f32.mrf.mxu0 }
 0x255   : > { %1789 = vst [vmem:[%s2908_s21 + $0x708] sm:$0xff] %v1148_v34  ;;  %1791 = vst [vmem:[%s2908_s21 + $0x718] sm:$0xff] %v1501_v44 }
 0x256   : > { %v1152_v57 = vpop.f32.mrf.mxu1  ;;  %v1505_v60 = vpop.f32.mrf.mxu0 }
 0x257   : > { %1794 = vst [vmem:[%s2908_s21 + $0x730] sm:$0xff] %v1152_v57  ;;  %1796 = vst [vmem:[%s2908_s21 + $0x740] sm:$0xff] %v1505_v60 }
 0x258   : > { %v1154_v61 = vpop.f32.mrf.mxu1  ;;  %v1507_v16 = vpop.f32.mrf.mxu0 }
 0x259   : > { %1795 = vst [vmem:[%s2908_s21 + $0x738] sm:$0xff] %v1154_v61  ;;  %1797 = vst [vmem:[%s2908_s21 + $0x748] sm:$0xff] %v1507_v16 }
 0x25a   : > { %v1158_v32 = vpop.f32.mrf.mxu1  ;;  %v1511_v33 = vpop.f32.mrf.mxu0 }
 0x25b   : > { %1800 = vst [vmem:[%s2908_s21 + $0x760] sm:$0xff] %v1158_v32  ;;  %1802 = vst [vmem:[%s2908_s21 + $0x770] sm:$0xff] %v1511_v33 }
 0x25c   : > { %v1160_v52 = vpop.f32.mrf.mxu1  ;;  %v1513_v9 = vpop.f32.mrf.mxu0 }
 0x25d   : > { %1801 = vst [vmem:[%s2908_s21 + $0x768] sm:$0xff] %v1160_v52  ;;  %1803 = vst [vmem:[%s2908_s21 + $0x778] sm:$0xff] %v1513_v9 }
 0x25e   : > { %v1164_v47 = vpop.f32.mrf.mxu1  ;;  %v1517_v24 = vpop.f32.mrf.mxu0 }
 0x25f   : > { %1806 = vst [vmem:[%s2908_s21 + $0x790] sm:$0xff] %v1164_v47  ;;  %1808 = vst [vmem:[%s2908_s21 + $0x7a0] sm:$0xff] %v1517_v24 }
 0x260   : > { %v1166_v17 = vpop.f32.mrf.mxu1  ;;  %v1519_v10 = vpop.f32.mrf.mxu0 }
 0x261   : > { %1807 = vst [vmem:[%s2908_s21 + $0x798] sm:$0xff] %v1166_v17  ;;  %1809 = vst [vmem:[%s2908_s21 + $0x7a8] sm:$0xff] %v1519_v10 }
 0x262   : > { %v1170_v39 = vpop.f32.mrf.mxu1  ;;  %v1523_v5 = vpop.f32.mrf.mxu0 }
 0x263   : > { %1812 = vst [vmem:[%s2908_s21 + $0x7c0] sm:$0xff] %v1170_v39  ;;  %1814 = vst [vmem:[%s2908_s21 + $0x7d0] sm:$0xff] %v1523_v5 }
 0x264   : > { %v1172_v7 = vpop.f32.mrf.mxu1  ;;  %v1525_v35 = vpop.f32.mrf.mxu0 }
 0x265   : > { %1813 = vst [vmem:[%s2908_s21 + $0x7c8] sm:$0xff] %v1172_v7  ;;  %1815 = vst [vmem:[%s2908_s21 + $0x7d8] sm:$0xff] %v1525_v35 }
 0x266   : > { %v1176_v48 = vpop.f32.mrf.mxu1  ;;  %v1529_v45 = vpop.f32.mrf.mxu0 }
 0x267   : > { %1818 = vst [vmem:[%s2908_s21 + $0x7f0] sm:$0xff] %v1176_v48  ;;  %1820 = vst [vmem:[%s2908_s21 + $0x800] sm:$0xff] %v1529_v45 }
 0x268   : > { %v1178_v25 = vpop.f32.mrf.mxu1  ;;  %v1531_v13 = vpop.f32.mrf.mxu0 }
 0x269   : > { %1819 = vst [vmem:[%s2908_s21 + $0x7f8] sm:$0xff] %v1178_v25  ;;  %1821 = vst [vmem:[%s2908_s21 + $0x808] sm:$0xff] %v1531_v13 }
 0x26a   : > { %v1182_v53 = vpop.f32.mrf.mxu1  ;;  %v1535_v0 = vpop.f32.mrf.mxu0 }
 0x26b   : > { %1824 = vst [vmem:[%s2908_s21 + $0x820] sm:$0xff] %v1182_v53  ;;  %1826 = vst [vmem:[%s2908_s21 + $0x830] sm:$0xff] %v1535_v0 }
 0x26c   : > { %v1184_v15 = vpop.f32.mrf.mxu1  ;;  %v1537_v2 = vpop.f32.mrf.mxu0 }
 0x26d   : > { %1825 = vst [vmem:[%s2908_s21 + $0x828] sm:$0xff] %v1184_v15  ;;  %1827 = vst [vmem:[%s2908_s21 + $0x838] sm:$0xff] %v1537_v2 }
 0x26e   : > { %v1188_v8 = vpop.f32.mrf.mxu1  ;;  %v1541_v20 = vpop.f32.mrf.mxu0 }
 0x26f   : > { %1830 = vst [vmem:[%s2908_s21 + $0x850] sm:$0xff] %v1188_v8  ;;  %1832 = vst [vmem:[%s2908_s21 + $0x860] sm:$0xff] %v1541_v20 }
 0x270   : > { %v1190_v12 = vpop.f32.mrf.mxu1  ;;  %v1543_v27 = vpop.f32.mrf.mxu0 }
 0x271   : > { %1831 = vst [vmem:[%s2908_s21 + $0x858] sm:$0xff] %v1190_v12  ;;  %1833 = vst [vmem:[%s2908_s21 + $0x868] sm:$0xff] %v1543_v27 }
 0x272   : > { %v1194_v18 = vpop.f32.mrf.mxu1  ;;  %v1547_v22 = vpop.f32.mrf.mxu0 }
 0x273   : > { %1836 = vst [vmem:[%s2908_s21 + $0x880] sm:$0xff] %v1194_v18  ;;  %1838 = vst [vmem:[%s2908_s21 + $0x890] sm:$0xff] %v1547_v22 }
 0x274   : > { %v1196_v31 = vpop.f32.mrf.mxu1  ;;  %v1549_v28 = vpop.f32.mrf.mxu0 }
 0x275   : > { %1837 = vst [vmem:[%s2908_s21 + $0x888] sm:$0xff] %v1196_v31  ;;  %1839 = vst [vmem:[%s2908_s21 + $0x898] sm:$0xff] %v1549_v28 }
 0x276   : > { %v1200_v30 = vpop.f32.mrf.mxu1  ;;  %v1553_v36 = vpop.f32.mrf.mxu0 }
 0x277   : > { %1842 = vst [vmem:[%s2908_s21 + $0x8b0] sm:$0xff] %v1200_v30  ;;  %1844 = vst [vmem:[%s2908_s21 + $0x8c0] sm:$0xff] %v1553_v36 }
 0x278   : > { %v1202_v40 = vpop.f32.mrf.mxu1  ;;  %v1555_v46 = vpop.f32.mrf.mxu0 }
 0x279   : > { %1843 = vst [vmem:[%s2908_s21 + $0x8b8] sm:$0xff] %v1202_v40  ;;  %1845 = vst [vmem:[%s2908_s21 + $0x8c8] sm:$0xff] %v1555_v46 }
 0x27a   : > { %v1206_v50 = vpop.f32.mrf.mxu1  ;;  %v1559_v56 = vpop.f32.mrf.mxu0 }
 0x27b   : > { %1848 = vst [vmem:[%s2908_s21 + $0x8e0] sm:$0xff] %v1206_v50  ;;  %1850 = vst [vmem:[%s2908_s21 + $0x8f0] sm:$0xff] %v1559_v56 }
 0x27c   : > { %v1208_v58 = vpop.f32.mrf.mxu1  ;;  %v1561_v1 = vpop.f32.mrf.mxu0 }
 0x27d   : > { %1849 = vst [vmem:[%s2908_s21 + $0x8e8] sm:$0xff] %v1208_v58  ;;  %1851 = vst [vmem:[%s2908_s21 + $0x8f8] sm:$0xff] %v1561_v1 }
 0x27e   : > { %2241 = shalt.err (!%p2238_p5)
}
 0x27f   : > { %s2242_s5 = scalar_lea.hbm %s3290_s28, 36864  ;;  %s2246_s3 = scalar_lea.hbm %s3351_s2, 147456 }
 0x280   : > { %p2243_p4 = scmp.ne.s32.totalorder %s3290_s28, %s2242_s5  ;;  %p2247_p9 = scmp.lt.s32.totalorder %s3290_s28, %s3351_s2 }
 0x281   : > { %p2248_p10 = scmp.lt.s32.totalorder %s2246_s3, %s2242_s5 }
 0x282   : > { %p2244_p6 = pnand %p2243_p4, %p2442_p11 }
 0x283   : > { %p2249_p12 = por %p2248_p10, %p2247_p9 }
 0x284   : > { %p2245_p7 = pneg %p2244_p6 }
 0x286   : > { %p2250_p1 = pnand %p2249_p12, %p2245_p7 }
 0x288   : > { %2253 = shalt.err (!%p2250_p1)
}
 0x289   : > { %s2337_s19 = smov 768   ;;  %s2338_s21 = smov 48  }
 0x28a   : > { %2067 = dma.vmem_to_hbm [thread:$0]  (%p2442_p11), %s3292_s13, 36864, %s3290_s28, %s1853_s29, %s2337_s19, %s2337_s19, %s2338_s21  }
 0x28b PF: > { %s3475_s23 = sld [smem:[#allocation12_spill]]  ;;  %p2085_p8 = scmp.ge.s32.totalorder %s2328_s16, 2 }
 0x28c   : > { %s1886_s4 = sand.u32 1, %s2300_s9  }
 0x28d   : > { %s1887_s25 = scalar_lea.sflag [#allocation4], %s1886_s4 }
 0x291   : > { %p3476_p13 = scmp.ne.s32.totalorder %s3475_s23, 0 }
 0x293   : > { %p2078_p0 = pnand %p2085_p8, %p3476_p13 }
 0x295   : > { %p2079_p2 = pneg %p2078_p0 }
 0x297   : > { %2295 = dma.done.wait (%p2079_p2), %s1887_s25, 36864  }
 0x298   : > { %2297 = vsyncadd (%p2079_p2), %s1887_s25, 4294930432  ;;  %s19_s16 = sadd.s32 1, %s2328_s16   ;;  %s3477_s13 = sld [smem:[#allocation11_spill]] }
 0x299   : > { %p16_p3 = scmp.ge.s32.totalorder %s19_s16, 6   ;;  %s3478_s7 = sld [smem:[#allocation13_spill]] }
 0x29a   : > { %s3479_s15 = sld [smem:[#allocation14_spill]]  ;;  %s3480_s9 = smov %s2304_s10 }
 0x29b   : > { %s3481_s10 = smov %s2308_s11  ;;  %s3482_s11 = smov %s2459_s20 }
 0x29c   : > { %s3483_s12 = smov %s2320_s14  ;;  %18 = sbr.rel (!%p16_p3) target bundleno = 10 (0xa), region = 78 }
 0x29f   : > { %s3484_s14 = smov %s3478_s7 }
 0x2a1   :  { %1892 = vsyncpa [#allocation3], 1 }
 0x2a2   :  { %1894 = vsyncpa [#allocation3 + $0x1], 1 }
 0x2a3   :  { %1895 = vsyncpa [#allocation6], 1 }
 0x2a4   :  { %1896 = vsyncpa [#allocation4], 1 }
 0x2a5   :  { %1898 = vsyncpa [#allocation4 + $0x1], 1 }

</bundles_post_ra>
